<compile_context>
chip_gen: v7x
topology: tpu7x:2x2x1
jax: 0.10.0
libtpu: 0.0.40
codegen_flags: <defaults>
</compile_context>

<pallas_src>
import jax
import jax.numpy as jnp
from jax import lax
from jax.experimental import pallas as pl
from jax.experimental.pallas import tpu as pltpu

# ---------------- config (small, consistent with the module) ----------------
B, C, H, W = 2, 4, 16, 16        # input images, NCHW
P = 8                            # patch size (conv kernel = stride = P)
N = (H // P) * (W // P)          # 4 patches per image
D = 32                           # embed dim
NH = 4                           # attention heads
HD = D // NH                     # head dim = 8
T = N + 2                        # tokens incl. cls + dist = 6
BT = B * T                       # 12 token rows total
R = NH * BT                      # 48 packed (head-major) attention rows
MLP = 4 * D                      # MLP hidden dim = 128
SPLIT_IDX = 2                    # number of blocks kept by FrontModel
L = SPLIT_IDX
LN_EPS = 1e-6
SCALE = 1.0 / (HD ** 0.5)
NEG_BIG = -1e30                  # additive mask for cross-(image,head) attention


def _layernorm(x, g, b):
    mu = jnp.mean(x, axis=-1, keepdims=True)
    var = jnp.mean((x - mu) ** 2, axis=-1, keepdims=True)
    return (x - mu) * lax.rsqrt(var + LN_EPS) * g + b


# --------------------------- fused Pallas kernel -----------------------------
def front_kernel(patches_ref,   # (B*N, C*P*P)   bf16
                 pe_w_ref,      # (C*P*P, D)     bf16
                 emb_ref,       # (3+N, D) f32: pe_b | cls+pos0 | dist+pos1 | pos[2:]
                 wqkv_ref,      # (L, D, 3D)     bf16 (q columns pre-scaled)
                 wproj_ref,     # (L, D, D)      bf16
                 w1_ref,        # (L, D, MLP)    bf16
                 w2_ref,        # (L, MLP, D)    bf16
                 vec_ref,       # (L, 8, MLP)    f32 packed small vectors
                 o_ref,         # (B*T, D)       f32
                 x_scr):        # VMEM scratch (B*T, D) f32
    # ---- patch embedding (bf16 MXU, f32 accumulate) ----
    emb = emb_ref[...]
    pe_b = emb[0:1, :]                         # (1, D)
    prefix_pos = emb[1:3, :]                   # (2, D)  cls+pos[0], dist+pos[1]
    pos_patch = emb[3:, :]                     # (N, D)
    tok = jnp.dot(patches_ref[...], pe_w_ref[...],
                  preferred_element_type=jnp.float32) + pe_b          # (B*N, D)

    # ---- token assembly via direct row stores (no sublane-concat chains) ----
    for b in range(B):
        x_scr[b * T:b * T + 2, :] = prefix_pos
        x_scr[b * T + 2:(b + 1) * T, :] = tok[b * N:(b + 1) * N, :] + pos_patch
    x = x_scr[...]                             # (BT, D); pos_drop = identity (eval)

    # ---- (head, image) block-diagonal additive mask, built in-kernel --------
    # valid iff row//T == col//T in the head-major packed layout; built without
    # integer division (division-free compare/or over the NH*B blocks).
    r_id = lax.broadcasted_iota(jnp.int32, (R, R), 0)
    c_id = lax.broadcasted_iota(jnp.int32, (R, R), 1)
    same = None
    for blk in range(NH * B):
        lo, hi = blk * T, (blk + 1) * T
        in_blk = (r_id >= lo) & (r_id < hi) & (c_id >= lo) & (c_id < hi)
        same = in_blk if same is None else (same | in_blk)
    mask = jnp.where(same, 0.0, NEG_BIG).astype(jnp.float32)          # (R, R)

    # ---- transformer blocks (static unroll over L) ----
    for l in range(L):
        vblk = vec_ref[l]                      # (8, MLP)
        ln1_g = vblk[0:1, :D]
        ln1_b = vblk[1:2, :D]
        bqkv = vblk[2:3, :3 * D]               # q part pre-scaled at pack time
        bproj = vblk[3:4, :D]
        ln2_g = vblk[4:5, :D]
        ln2_b = vblk[5:6, :D]
        b1 = vblk[6:7, :]
        b2 = vblk[7:8, :D]

        # --- multi-head self-attention: all heads in one packed (R, HD) tile ---
        h = _layernorm(x, ln1_g, ln1_b)
        qkv = jnp.dot(h.astype(jnp.bfloat16), wqkv_ref[l],
                      preferred_element_type=jnp.float32) + bqkv      # (BT, 3D)
        q = qkv[:, :D]                         # already scaled by 1/sqrt(HD)
        k = qkv[:, D:2 * D]
        v = qkv[:, 2 * D:]
        # head-major packing: row hi*BT + r  <-  head hi of token r
        qp = jnp.concatenate([q[:, i * HD:(i + 1) * HD] for i in range(NH)], axis=0)
        kp = jnp.concatenate([k[:, i * HD:(i + 1) * HD] for i in range(NH)], axis=0)
        vp = jnp.concatenate([v[:, i * HD:(i + 1) * HD] for i in range(NH)], axis=0)

        # one score matmul for all heads, transpose-free (contract last with last)
        s = lax.dot_general(qp.astype(jnp.bfloat16), kp.astype(jnp.bfloat16),
                            dimension_numbers=(((1,), (1,)), ((), ())),
                            preferred_element_type=jnp.float32) + mask  # (R, R)
        s = s - jnp.max(s, axis=-1, keepdims=True)
        p = jnp.exp(s)
        p = p * (1.0 / jnp.sum(p, axis=-1, keepdims=True))   # exact softmax norm
        op = jnp.dot(p.astype(jnp.bfloat16), vp.astype(jnp.bfloat16),
                     preferred_element_type=jnp.float32)              # (R, HD)
        # relayout heads back onto the lane axis, then ONE projection matmul
        o_heads = jnp.concatenate([op[i * BT:(i + 1) * BT, :] for i in range(NH)],
                                  axis=1)                             # (BT, D)
        attn = jnp.dot(o_heads.astype(jnp.bfloat16), wproj_ref[l],
                       preferred_element_type=jnp.float32) + bproj
        x = x + attn                            # residual

        # --- MLP ---
        h = _layernorm(x, ln2_g, ln2_b)
        h = jnp.dot(h.astype(jnp.bfloat16), w1_ref[l],
                    preferred_element_type=jnp.float32) + b1
        # TODO(synk): torch nn.GELU default is exact erf; using tanh approximation.
        h = jax.nn.gelu(h, approximate=True)
        h = jnp.dot(h.astype(jnp.bfloat16), w2_ref[l],
                    preferred_element_type=jnp.float32) + b2
        x = x + h                               # residual

    o_ref[...] = x                              # single full-block store


# ------------------------------ wrappers -------------------------------------
def extract_patches(x):
    # NCHW -> (B*N, C*P*P); patch flatten order (C, ph, pw) matches the
    # flattening of the conv weight (D, C, P, P) -> (C*P*P, D).
    xb = x.reshape(B, C, H // P, P, W // P, P)
    xb = jnp.transpose(xb, (0, 2, 4, 1, 3, 5))      # (B, Hp, Wp, C, P, P)
    return xb.reshape(B * N, C * P * P)


def _pack_vec_row(v):
    v = v.reshape(-1)
    return jnp.pad(v, (0, MLP - v.shape[0]))


def pack_params(params):
    """ONE-TIME packing done at init (not in the per-call forward path)."""
    scale_row = jnp.concatenate(
        [jnp.full((1, D), SCALE, jnp.float32),
         jnp.ones((1, 2 * D), jnp.float32)], axis=1)            # fold 1/sqrt(HD) into q

    pos = params["pos_embed"].reshape(T, D)
    emb = jnp.concatenate([
        params["pe_b"].reshape(1, D),
        params["cls_token"].reshape(1, D) + pos[0:1],
        params["dist_token"].reshape(1, D) + pos[1:2],
        pos[2:],
    ], axis=0).astype(jnp.float32)                               # (3+N, D)

    blocks = params["blocks"]

    def vec_rows(p):
        rows = [p["ln1_g"], p["ln1_b"], p["bqkv"] * scale_row, p["bproj"],
                p["ln2_g"], p["ln2_b"], p["b1"], p["b2"]]
        return jnp.stack([_pack_vec_row(r) for r in rows])       # (8, MLP)

    return {
        "pe_w": params["pe_w"].astype(jnp.bfloat16),
        "emb": emb,
        "wqkv": jnp.stack([p["wqkv"] * scale_row for p in blocks]).astype(jnp.bfloat16),
        "wproj": jnp.stack([p["wproj"] for p in blocks]).astype(jnp.bfloat16),
        "w1": jnp.stack([p["w1"] for p in blocks]).astype(jnp.bfloat16),
        "w2": jnp.stack([p["w2"] for p in blocks]).astype(jnp.bfloat16),
        "vec": jnp.stack([vec_rows(p) for p in blocks]).astype(jnp.float32),
    }


def front_model(x, packed):
    # Only glue left in the per-call path: patch extraction (+ bf16 cast fused in).
    patches = extract_patches(x).astype(jnp.bfloat16)
    out = pl.pallas_call(
        front_kernel,
        out_shape=jax.ShapeDtypeStruct((BT, D), jnp.float32),
        scratch_shapes=[pltpu.VMEM((BT, D), jnp.float32)],
    )(patches, packed["pe_w"], packed["emb"], packed["wqkv"], packed["wproj"],
      packed["w1"], packed["w2"], packed["vec"])
    return out.reshape(B, T, D)


# --------------------------- deterministic params ----------------------------
def make_params(key):
    ks = iter(jax.random.split(key, 64))
    nrm = lambda shp, s=0.02: s * jax.random.normal(next(ks), shp, jnp.float32)

    conv_w = nrm((D, C, P, P))                       # Conv2d(C, D, k=P, s=P)
    params = {
        "pe_w": conv_w.reshape(D, C * P * P).T,      # (C*P*P, D)
        "pe_b": nrm((1, D)),
        "cls_token": nrm((1, 1, D)),
        "dist_token": nrm((1, 1, D)),
        "pos_embed": nrm((1, T, D)),
        "blocks": [],
    }
    for _ in range(SPLIT_IDX):
        params["blocks"].append({
            "ln1_g": jnp.ones((1, D), jnp.float32),
            "ln1_b": jnp.zeros((1, D), jnp.float32),
            "wqkv": nrm((D, 3 * D)),
            "bqkv": nrm((1, 3 * D)),
            "wproj": nrm((D, D)),
            "bproj": nrm((1, D)),
            "ln2_g": jnp.ones((1, D), jnp.float32),
            "ln2_b": jnp.zeros((1, D), jnp.float32),
            "w1": nrm((D, MLP)),
            "b1": nrm((1, MLP)),
            "w2": nrm((MLP, D)),
            "b2": nrm((1, D)),
        })
    return params


if __name__ == "__main__":
    key = jax.random.PRNGKey(0)
    k_in, k_par = jax.random.split(key)
    x = jax.random.normal(k_in, (B, C, H, W), dtype=jnp.float32)
    params = make_params(k_par)

    # one-time packing at "init"; the forward path never re-packs weights
    packed = jax.block_until_ready(pack_params(params))

    fwd = jax.jit(front_model)
    out = jax.block_until_ready(fwd(x, packed))
    assert out.shape == (B, T, D), out.shape
    assert bool(jnp.all(jnp.isfinite(out)))
    print("KERNEL_OK")
</pallas_src>

<mosaic_0001>
module attributes {stable_mosaic.version = 11 : i64} {
  func.func @front_kernel(%arg0: memref<8x256xbf16, #tpu.memory_space<vmem>>, %arg1: memref<256x32xbf16, #tpu.memory_space<vmem>>, %arg2: memref<7x32xf32, #tpu.memory_space<vmem>>, %arg3: memref<2x32x96xbf16, #tpu.memory_space<vmem>>, %arg4: memref<2x32x32xbf16, #tpu.memory_space<vmem>>, %arg5: memref<2x32x128xbf16, #tpu.memory_space<vmem>>, %arg6: memref<2x128x32xbf16, #tpu.memory_space<vmem>>, %arg7: memref<2x8x128xf32, #tpu.memory_space<vmem>>, %arg8: memref<12x32xf32, #tpu.memory_space<vmem>>, %arg9: memref<12x32xf32, #tpu.memory_space<vmem>>) attributes {dimension_semantics = [], scalar_prefetch = 0 : i64, scratch_operands = 1 : i64, tpu.core_type = #tpu.core_type<tc>} {
    %c0 = arith.constant 0 : index
    %c0_0 = arith.constant 0 : index
    %0 = vector.load %arg2[%c0, %c0_0] : memref<7x32xf32, #tpu.memory_space<vmem>>, vector<7x32xf32>
    %1 = vector.extract_strided_slice %0 {offsets = [0, 0], sizes = [1, 32], strides = [1, 1]} : vector<7x32xf32> to vector<1x32xf32>
    %2 = vector.extract_strided_slice %0 {offsets = [1, 0], sizes = [2, 32], strides = [1, 1]} : vector<7x32xf32> to vector<2x32xf32>
    %3 = vector.extract_strided_slice %0 {offsets = [3, 0], sizes = [4, 32], strides = [1, 1]} : vector<7x32xf32> to vector<4x32xf32>
    %c0_1 = arith.constant 0 : index
    %c0_2 = arith.constant 0 : index
    %4 = vector.load %arg0[%c0_1, %c0_2] : memref<8x256xbf16, #tpu.memory_space<vmem>>, vector<8x256xbf16>
    %c0_3 = arith.constant 0 : index
    %c0_4 = arith.constant 0 : index
    %5 = vector.load %arg1[%c0_3, %c0_4] : memref<256x32xbf16, #tpu.memory_space<vmem>>, vector<256x32xbf16>
    %cst = arith.constant dense<0.000000e+00> : vector<8x32xf32>
    %6 = tpu.matmul %4, %5, %cst {dimension_numbers = #tpu.dot_dimension_numbers<[1], [0], [0], [1], [0, 0, 1, 1], [], []>} : vector<8x256xbf16>, vector<256x32xbf16>, vector<8x32xf32> -> vector<8x32xf32>
    %7 = vector.broadcast %1 : vector<1x32xf32> to vector<8x32xf32>
    %8 = arith.addf %6, %7 : vector<8x32xf32>
    %c0_5 = arith.constant 0 : index
    %c0_6 = arith.constant 0 : index
    %9 = vector.load %arg9[%c0_5, %c0_6] : memref<12x32xf32, #tpu.memory_space<vmem>>, vector<2x32xf32>
    tpu.vector_store %arg9[%c0_5, %c0_6], %2 {strides = array<i32>} : memref<12x32xf32, #tpu.memory_space<vmem>>, vector<2x32xf32>,
    %10 = vector.extract_strided_slice %8 {offsets = [0, 0], sizes = [4, 32], strides = [1, 1]} : vector<8x32xf32> to vector<4x32xf32>
    %11 = arith.addf %10, %3 : vector<4x32xf32>
    %c2 = arith.constant 2 : index
    %c0_7 = arith.constant 0 : index
    %12 = vector.load %arg9[%c2, %c0_7] : memref<12x32xf32, #tpu.memory_space<vmem>>, vector<4x32xf32>
    tpu.vector_store %arg9[%c2, %c0_7], %11 {strides = array<i32>} : memref<12x32xf32, #tpu.memory_space<vmem>>, vector<4x32xf32>,
    %c6 = arith.constant 6 : index
    %c0_8 = arith.constant 0 : index
    %13 = vector.load %arg9[%c6, %c0_8] : memref<12x32xf32, #tpu.memory_space<vmem>>, vector<2x32xf32>
    tpu.vector_store %arg9[%c6, %c0_8], %2 {strides = array<i32>} : memref<12x32xf32, #tpu.memory_space<vmem>>, vector<2x32xf32>,
    %14 = vector.extract_strided_slice %8 {offsets = [4, 0], sizes = [4, 32], strides = [1, 1]} : vector<8x32xf32> to vector<4x32xf32>
    %15 = arith.addf %14, %3 : vector<4x32xf32>
    %c8 = arith.constant 8 : index
    %c0_9 = arith.constant 0 : index
    %16 = vector.load %arg9[%c8, %c0_9] : memref<12x32xf32, #tpu.memory_space<vmem>>, vector<4x32xf32>
    tpu.vector_store %arg9[%c8, %c0_9], %15 {strides = array<i32>} : memref<12x32xf32, #tpu.memory_space<vmem>>, vector<4x32xf32>,
    %c0_10 = arith.constant 0 : index
    %c0_11 = arith.constant 0 : index
    %17 = vector.load %arg9[%c0_10, %c0_11] : memref<12x32xf32, #tpu.memory_space<vmem>>, vector<12x32xf32>
    %18 = tpu.iota {dimensions = array<i32: 0>} : vector<48x48xi32>
    %19 = tpu.iota {dimensions = array<i32: 1>} : vector<48x48xi32>
    %c0_i32 = arith.constant 0 : i32
    %20 = vector.broadcast %c0_i32 : i32 to vector<48x48xi32>
    %21 = arith.cmpi sge, %18, %20 : vector<48x48xi32>
    %c6_i32 = arith.constant 6 : i32
    %22 = vector.broadcast %c6_i32 : i32 to vector<48x48xi32>
    %23 = arith.cmpi slt, %18, %22 : vector<48x48xi32>
    %24 = arith.andi %21, %23 : vector<48x48xi1>
    %c0_i32_12 = arith.constant 0 : i32
    %25 = vector.broadcast %c0_i32_12 : i32 to vector<48x48xi32>
    %26 = arith.cmpi sge, %19, %25 : vector<48x48xi32>
    %27 = arith.andi %24, %26 : vector<48x48xi1>
    %c6_i32_13 = arith.constant 6 : i32
    %28 = vector.broadcast %c6_i32_13 : i32 to vector<48x48xi32>
    %29 = arith.cmpi slt, %19, %28 : vector<48x48xi32>
    %30 = arith.andi %27, %29 : vector<48x48xi1>
    %c6_i32_14 = arith.constant 6 : i32
    %31 = vector.broadcast %c6_i32_14 : i32 to vector<48x48xi32>
    %32 = arith.cmpi sge, %18, %31 : vector<48x48xi32>
    %c12_i32 = arith.constant 12 : i32
    %33 = vector.broadcast %c12_i32 : i32 to vector<48x48xi32>
    %34 = arith.cmpi slt, %18, %33 : vector<48x48xi32>
    %35 = arith.andi %32, %34 : vector<48x48xi1>
    %c6_i32_15 = arith.constant 6 : i32
    %36 = vector.broadcast %c6_i32_15 : i32 to vector<48x48xi32>
    %37 = arith.cmpi sge, %19, %36 : vector<48x48xi32>
    %38 = arith.andi %35, %37 : vector<48x48xi1>
    %c12_i32_16 = arith.constant 12 : i32
    %39 = vector.broadcast %c12_i32_16 : i32 to vector<48x48xi32>
    %40 = arith.cmpi slt, %19, %39 : vector<48x48xi32>
    %41 = arith.andi %38, %40 : vector<48x48xi1>
    %42 = arith.ori %30, %41 : vector<48x48xi1>
    %c12_i32_17 = arith.constant 12 : i32
    %43 = vector.broadcast %c12_i32_17 : i32 to vector<48x48xi32>
    %44 = arith.cmpi sge, %18, %43 : vector<48x48xi32>
    %c18_i32 = arith.constant 18 : i32
    %45 = vector.broadcast %c18_i32 : i32 to vector<48x48xi32>
    %46 = arith.cmpi slt, %18, %45 : vector<48x48xi32>
    %47 = arith.andi %44, %46 : vector<48x48xi1>
    %c12_i32_18 = arith.constant 12 : i32
    %48 = vector.broadcast %c12_i32_18 : i32 to vector<48x48xi32>
    %49 = arith.cmpi sge, %19, %48 : vector<48x48xi32>
    %50 = arith.andi %47, %49 : vector<48x48xi1>
    %c18_i32_19 = arith.constant 18 : i32
    %51 = vector.broadcast %c18_i32_19 : i32 to vector<48x48xi32>
    %52 = arith.cmpi slt, %19, %51 : vector<48x48xi32>
    %53 = arith.andi %50, %52 : vector<48x48xi1>
    %54 = arith.ori %42, %53 : vector<48x48xi1>
    %c18_i32_20 = arith.constant 18 : i32
    %55 = vector.broadcast %c18_i32_20 : i32 to vector<48x48xi32>
    %56 = arith.cmpi sge, %18, %55 : vector<48x48xi32>
    %c24_i32 = arith.constant 24 : i32
    %57 = vector.broadcast %c24_i32 : i32 to vector<48x48xi32>
    %58 = arith.cmpi slt, %18, %57 : vector<48x48xi32>
    %59 = arith.andi %56, %58 : vector<48x48xi1>
    %c18_i32_21 = arith.constant 18 : i32
    %60 = vector.broadcast %c18_i32_21 : i32 to vector<48x48xi32>
    %61 = arith.cmpi sge, %19, %60 : vector<48x48xi32>
    %62 = arith.andi %59, %61 : vector<48x48xi1>
    %c24_i32_22 = arith.constant 24 : i32
    %63 = vector.broadcast %c24_i32_22 : i32 to vector<48x48xi32>
    %64 = arith.cmpi slt, %19, %63 : vector<48x48xi32>
    %65 = arith.andi %62, %64 : vector<48x48xi1>
    %66 = arith.ori %54, %65 : vector<48x48xi1>
    %c24_i32_23 = arith.constant 24 : i32
    %67 = vector.broadcast %c24_i32_23 : i32 to vector<48x48xi32>
    %68 = arith.cmpi sge, %18, %67 : vector<48x48xi32>
    %c30_i32 = arith.constant 30 : i32
    %69 = vector.broadcast %c30_i32 : i32 to vector<48x48xi32>
    %70 = arith.cmpi slt, %18, %69 : vector<48x48xi32>
    %71 = arith.andi %68, %70 : vector<48x48xi1>
    %c24_i32_24 = arith.constant 24 : i32
    %72 = vector.broadcast %c24_i32_24 : i32 to vector<48x48xi32>
    %73 = arith.cmpi sge, %19, %72 : vector<48x48xi32>
    %74 = arith.andi %71, %73 : vector<48x48xi1>
    %c30_i32_25 = arith.constant 30 : i32
    %75 = vector.broadcast %c30_i32_25 : i32 to vector<48x48xi32>
    %76 = arith.cmpi slt, %19, %75 : vector<48x48xi32>
    %77 = arith.andi %74, %76 : vector<48x48xi1>
    %78 = arith.ori %66, %77 : vector<48x48xi1>
    %c30_i32_26 = arith.constant 30 : i32
    %79 = vector.broadcast %c30_i32_26 : i32 to vector<48x48xi32>
    %80 = arith.cmpi sge, %18, %79 : vector<48x48xi32>
    %c36_i32 = arith.constant 36 : i32
    %81 = vector.broadcast %c36_i32 : i32 to vector<48x48xi32>
    %82 = arith.cmpi slt, %18, %81 : vector<48x48xi32>
    %83 = arith.andi %80, %82 : vector<48x48xi1>
    %c30_i32_27 = arith.constant 30 : i32
    %84 = vector.broadcast %c30_i32_27 : i32 to vector<48x48xi32>
    %85 = arith.cmpi sge, %19, %84 : vector<48x48xi32>
    %86 = arith.andi %83, %85 : vector<48x48xi1>
    %c36_i32_28 = arith.constant 36 : i32
    %87 = vector.broadcast %c36_i32_28 : i32 to vector<48x48xi32>
    %88 = arith.cmpi slt, %19, %87 : vector<48x48xi32>
    %89 = arith.andi %86, %88 : vector<48x48xi1>
    %90 = arith.ori %78, %89 : vector<48x48xi1>
    %c36_i32_29 = arith.constant 36 : i32
    %91 = vector.broadcast %c36_i32_29 : i32 to vector<48x48xi32>
    %92 = arith.cmpi sge, %18, %91 : vector<48x48xi32>
    %c42_i32 = arith.constant 42 : i32
    %93 = vector.broadcast %c42_i32 : i32 to vector<48x48xi32>
    %94 = arith.cmpi slt, %18, %93 : vector<48x48xi32>
    %95 = arith.andi %92, %94 : vector<48x48xi1>
    %c36_i32_30 = arith.constant 36 : i32
    %96 = vector.broadcast %c36_i32_30 : i32 to vector<48x48xi32>
    %97 = arith.cmpi sge, %19, %96 : vector<48x48xi32>
    %98 = arith.andi %95, %97 : vector<48x48xi1>
    %c42_i32_31 = arith.constant 42 : i32
    %99 = vector.broadcast %c42_i32_31 : i32 to vector<48x48xi32>
    %100 = arith.cmpi slt, %19, %99 : vector<48x48xi32>
    %101 = arith.andi %98, %100 : vector<48x48xi1>
    %102 = arith.ori %90, %101 : vector<48x48xi1>
    %c42_i32_32 = arith.constant 42 : i32
    %103 = vector.broadcast %c42_i32_32 : i32 to vector<48x48xi32>
    %104 = arith.cmpi sge, %18, %103 : vector<48x48xi32>
    %c48_i32 = arith.constant 48 : i32
    %105 = vector.broadcast %c48_i32 : i32 to vector<48x48xi32>
    %106 = arith.cmpi slt, %18, %105 : vector<48x48xi32>
    %107 = arith.andi %104, %106 : vector<48x48xi1>
    %c42_i32_33 = arith.constant 42 : i32
    %108 = vector.broadcast %c42_i32_33 : i32 to vector<48x48xi32>
    %109 = arith.cmpi sge, %19, %108 : vector<48x48xi32>
    %110 = arith.andi %107, %109 : vector<48x48xi1>
    %c48_i32_34 = arith.constant 48 : i32
    %111 = vector.broadcast %c48_i32_34 : i32 to vector<48x48xi32>
    %112 = arith.cmpi slt, %19, %111 : vector<48x48xi32>
    %113 = arith.andi %110, %112 : vector<48x48xi1>
    %114 = arith.ori %102, %113 : vector<48x48xi1>
    %cst_35 = arith.constant 0.000000e+00 : f32
    %cst_36 = arith.constant -1.000000e+30 : f32
    %115 = vector.broadcast %cst_35 : f32 to vector<48x48xf32>
    %116 = vector.broadcast %cst_36 : f32 to vector<48x48xf32>
    %117 = arith.select %114, %115, %116 : vector<48x48xi1>, vector<48x48xf32>
    %c0_37 = arith.constant 0 : index
    %c0_38 = arith.constant 0 : index
    %c0_39 = arith.constant 0 : index
    %118 = vector.load %arg7[%c0_37, %c0_38, %c0_39] : memref<2x8x128xf32, #tpu.memory_space<vmem>>, vector<1x8x128xf32>
    %119 = vector.shape_cast %118 : vector<1x8x128xf32> to vector<8x128xf32>
    %120 = vector.extract_strided_slice %119 {offsets = [0, 0], sizes = [1, 32], strides = [1, 1]} : vector<8x128xf32> to vector<1x32xf32>
    %121 = vector.extract_strided_slice %119 {offsets = [1, 0], sizes = [1, 32], strides = [1, 1]} : vector<8x128xf32> to vector<1x32xf32>
    %122 = vector.extract_strided_slice %119 {offsets = [2, 0], sizes = [1, 96], strides = [1, 1]} : vector<8x128xf32> to vector<1x96xf32>
    %123 = vector.extract_strided_slice %119 {offsets = [3, 0], sizes = [1, 32], strides = [1, 1]} : vector<8x128xf32> to vector<1x32xf32>
    %124 = vector.extract_strided_slice %119 {offsets = [4, 0], sizes = [1, 32], strides = [1, 1]} : vector<8x128xf32> to vector<1x32xf32>
    %125 = vector.extract_strided_slice %119 {offsets = [5, 0], sizes = [1, 32], strides = [1, 1]} : vector<8x128xf32> to vector<1x32xf32>
    %126 = vector.extract_strided_slice %119 {offsets = [6, 0], sizes = [1, 128], strides = [1, 1]} : vector<8x128xf32> to vector<1x128xf32>
    %127 = vector.extract_strided_slice %119 {offsets = [7, 0], sizes = [1, 32], strides = [1, 1]} : vector<8x128xf32> to vector<1x32xf32>
    %cst_40 = arith.constant dense<0.000000e+00> : vector<12xf32>
    %128 = vector.multi_reduction <add>, %17, %cst_40 [1] : vector<12x32xf32> to vector<12xf32>
    %129 = vector.shape_cast %128 : vector<12xf32> to vector<12x1xf32>
    %cst_41 = arith.constant 3.200000e+01 : f32
    %130 = vector.broadcast %cst_41 : f32 to vector<12x1xf32>
    %131 = arith.divf %129, %130 : vector<12x1xf32>
    %132 = vector.broadcast %131 : vector<12x1xf32> to vector<12x32xf32>
    %133 = arith.subf %17, %132 : vector<12x32xf32>
    %134 = arith.mulf %133, %133 : vector<12x32xf32>
    %cst_42 = arith.constant dense<0.000000e+00> : vector<12xf32>
    %135 = vector.multi_reduction <add>, %134, %cst_42 [1] : vector<12x32xf32> to vector<12xf32>
    %136 = vector.shape_cast %135 : vector<12xf32> to vector<12x1xf32>
    %cst_43 = arith.constant 3.200000e+01 : f32
    %137 = vector.broadcast %cst_43 : f32 to vector<12x1xf32>
    %138 = arith.divf %136, %137 : vector<12x1xf32>
    %139 = vector.broadcast %131 : vector<12x1xf32> to vector<12x32xf32>
    %140 = arith.subf %17, %139 : vector<12x32xf32>
    %cst_44 = arith.constant 9.99999997E-7 : f32
    %141 = vector.broadcast %cst_44 : f32 to vector<12x1xf32>
    %142 = arith.addf %138, %141 : vector<12x1xf32>
    %143 = math.rsqrt %142 : vector<12x1xf32>
    %144 = vector.broadcast %143 : vector<12x1xf32> to vector<12x32xf32>
    %145 = arith.mulf %140, %144 : vector<12x32xf32>
    %146 = vector.broadcast %120 : vector<1x32xf32> to vector<12x32xf32>
    %147 = arith.mulf %145, %146 : vector<12x32xf32>
    %148 = vector.broadcast %121 : vector<1x32xf32> to vector<12x32xf32>
    %149 = arith.addf %147, %148 : vector<12x32xf32>
    %150 = arith.truncf %149 : vector<12x32xf32> to vector<12x32xbf16>
    %c0_45 = arith.constant 0 : index
    %c0_46 = arith.constant 0 : index
    %c0_47 = arith.constant 0 : index
    %151 = vector.load %arg3[%c0_45, %c0_46, %c0_47] : memref<2x32x96xbf16, #tpu.memory_space<vmem>>, vector<1x32x96xbf16>
    %152 = vector.shape_cast %151 : vector<1x32x96xbf16> to vector<32x96xbf16>
    %cst_48 = arith.constant dense<0.000000e+00> : vector<12x96xf32>
    %153 = tpu.matmul %150, %152, %cst_48 {dimension_numbers = #tpu.dot_dimension_numbers<[1], [0], [0], [1], [0, 0, 1, 1], [], []>} : vector<12x32xbf16>, vector<32x96xbf16>, vector<12x96xf32> -> vector<12x96xf32>
    %154 = vector.broadcast %122 : vector<1x96xf32> to vector<12x96xf32>
    %155 = arith.addf %153, %154 : vector<12x96xf32>
    %156 = vector.extract_strided_slice %155 {offsets = [0, 0], sizes = [12, 32], strides = [1, 1]} : vector<12x96xf32> to vector<12x32xf32>
    %157 = vector.extract_strided_slice %155 {offsets = [0, 32], sizes = [12, 32], strides = [1, 1]} : vector<12x96xf32> to vector<12x32xf32>
    %158 = vector.extract_strided_slice %155 {offsets = [0, 64], sizes = [12, 32], strides = [1, 1]} : vector<12x96xf32> to vector<12x32xf32>
    %159 = vector.extract_strided_slice %156 {offsets = [0, 0], sizes = [12, 8], strides = [1, 1]} : vector<12x32xf32> to vector<12x8xf32>
    %160 = vector.extract_strided_slice %156 {offsets = [0, 8], sizes = [12, 8], strides = [1, 1]} : vector<12x32xf32> to vector<12x8xf32>
    %161 = vector.extract_strided_slice %156 {offsets = [0, 16], sizes = [12, 8], strides = [1, 1]} : vector<12x32xf32> to vector<12x8xf32>
    %162 = vector.extract_strided_slice %156 {offsets = [0, 24], sizes = [12, 8], strides = [1, 1]} : vector<12x32xf32> to vector<12x8xf32>
    %163 = tpu.concatenate %159, %160, %161, %162 in 0 : vector<12x8xf32>, vector<12x8xf32>, vector<12x8xf32>, vector<12x8xf32> -> vector<48x8xf32>
    %164 = vector.extract_strided_slice %157 {offsets = [0, 0], sizes = [12, 8], strides = [1, 1]} : vector<12x32xf32> to vector<12x8xf32>
    %165 = vector.extract_strided_slice %157 {offsets = [0, 8], sizes = [12, 8], strides = [1, 1]} : vector<12x32xf32> to vector<12x8xf32>
    %166 = vector.extract_strided_slice %157 {offsets = [0, 16], sizes = [12, 8], strides = [1, 1]} : vector<12x32xf32> to vector<12x8xf32>
    %167 = vector.extract_strided_slice %157 {offsets = [0, 24], sizes = [12, 8], strides = [1, 1]} : vector<12x32xf32> to vector<12x8xf32>
    %168 = tpu.concatenate %164, %165, %166, %167 in 0 : vector<12x8xf32>, vector<12x8xf32>, vector<12x8xf32>, vector<12x8xf32> -> vector<48x8xf32>
    %169 = vector.extract_strided_slice %158 {offsets = [0, 0], sizes = [12, 8], strides = [1, 1]} : vector<12x32xf32> to vector<12x8xf32>
    %170 = vector.extract_strided_slice %158 {offsets = [0, 8], sizes = [12, 8], strides = [1, 1]} : vector<12x32xf32> to vector<12x8xf32>
    %171 = vector.extract_strided_slice %158 {offsets = [0, 16], sizes = [12, 8], strides = [1, 1]} : vector<12x32xf32> to vector<12x8xf32>
    %172 = vector.extract_strided_slice %158 {offsets = [0, 24], sizes = [12, 8], strides = [1, 1]} : vector<12x32xf32> to vector<12x8xf32>
    %173 = tpu.concatenate %169, %170, %171, %172 in 0 : vector<12x8xf32>, vector<12x8xf32>, vector<12x8xf32>, vector<12x8xf32> -> vector<48x8xf32>
    %174 = arith.truncf %163 : vector<48x8xf32> to vector<48x8xbf16>
    %175 = arith.truncf %168 : vector<48x8xf32> to vector<48x8xbf16>
    %cst_49 = arith.constant dense<0.000000e+00> : vector<48x48xf32>
    %176 = tpu.matmul %174, %175, %cst_49 {dimension_numbers = #tpu.dot_dimension_numbers<[1], [1], [0], [0], [0, 0, 1, 0], [], []>} : vector<48x8xbf16>, vector<48x8xbf16>, vector<48x48xf32> -> vector<48x48xf32>
    %177 = arith.addf %176, %117 : vector<48x48xf32>
    %cst_50 = arith.constant dense<0xFF800000> : vector<48xf32>
    %178 = vector.multi_reduction <maximumf>, %177, %cst_50 [1] : vector<48x48xf32> to vector<48xf32>
    %179 = vector.shape_cast %178 : vector<48xf32> to vector<48x1xf32>
    %180 = vector.broadcast %179 : vector<48x1xf32> to vector<48x48xf32>
    %181 = arith.subf %177, %180 : vector<48x48xf32>
    %182 = math.exp %181 : vector<48x48xf32>
    %cst_51 = arith.constant dense<0.000000e+00> : vector<48xf32>
    %183 = vector.multi_reduction <add>, %182, %cst_51 [1] : vector<48x48xf32> to vector<48xf32>
    %184 = vector.shape_cast %183 : vector<48xf32> to vector<48x1xf32>
    %cst_52 = arith.constant 1.000000e+00 : f32
    %185 = vector.broadcast %cst_52 : f32 to vector<48x1xf32>
    %186 = arith.divf %185, %184 : vector<48x1xf32>
    %187 = vector.broadcast %186 : vector<48x1xf32> to vector<48x48xf32>
    %188 = arith.mulf %182, %187 : vector<48x48xf32>
    %189 = arith.truncf %188 : vector<48x48xf32> to vector<48x48xbf16>
    %190 = arith.truncf %173 : vector<48x8xf32> to vector<48x8xbf16>
    %cst_53 = arith.constant dense<0.000000e+00> : vector<48x8xf32>
    %191 = tpu.matmul %189, %190, %cst_53 {dimension_numbers = #tpu.dot_dimension_numbers<[1], [0], [0], [1], [0, 0, 1, 1], [], []>} : vector<48x48xbf16>, vector<48x8xbf16>, vector<48x8xf32> -> vector<48x8xf32>
    %192 = vector.extract_strided_slice %191 {offsets = [0, 0], sizes = [12, 8], strides = [1, 1]} : vector<48x8xf32> to vector<12x8xf32>
    %193 = vector.extract_strided_slice %191 {offsets = [12, 0], sizes = [12, 8], strides = [1, 1]} : vector<48x8xf32> to vector<12x8xf32>
    %194 = vector.extract_strided_slice %191 {offsets = [24, 0], sizes = [12, 8], strides = [1, 1]} : vector<48x8xf32> to vector<12x8xf32>
    %195 = vector.extract_strided_slice %191 {offsets = [36, 0], sizes = [12, 8], strides = [1, 1]} : vector<48x8xf32> to vector<12x8xf32>
    %196 = tpu.concatenate %192, %193, %194, %195 in 1 : vector<12x8xf32>, vector<12x8xf32>, vector<12x8xf32>, vector<12x8xf32> -> vector<12x32xf32>
    %197 = arith.truncf %196 : vector<12x32xf32> to vector<12x32xbf16>
    %c0_54 = arith.constant 0 : index
    %c0_55 = arith.constant 0 : index
    %c0_56 = arith.constant 0 : index
    %198 = vector.load %arg4[%c0_54, %c0_55, %c0_56] : memref<2x32x32xbf16, #tpu.memory_space<vmem>>, vector<1x32x32xbf16>
    %199 = vector.shape_cast %198 : vector<1x32x32xbf16> to vector<32x32xbf16>
    %cst_57 = arith.constant dense<0.000000e+00> : vector<12x32xf32>
    %200 = tpu.matmul %197, %199, %cst_57 {dimension_numbers = #tpu.dot_dimension_numbers<[1], [0], [0], [1], [0, 0, 1, 1], [], []>} : vector<12x32xbf16>, vector<32x32xbf16>, vector<12x32xf32> -> vector<12x32xf32>
    %201 = vector.broadcast %123 : vector<1x32xf32> to vector<12x32xf32>
    %202 = arith.addf %200, %201 : vector<12x32xf32>
    %203 = arith.addf %17, %202 : vector<12x32xf32>
    %cst_58 = arith.constant dense<0.000000e+00> : vector<12xf32>
    %204 = vector.multi_reduction <add>, %203, %cst_58 [1] : vector<12x32xf32> to vector<12xf32>
    %205 = vector.shape_cast %204 : vector<12xf32> to vector<12x1xf32>
    %cst_59 = arith.constant 3.200000e+01 : f32
    %206 = vector.broadcast %cst_59 : f32 to vector<12x1xf32>
    %207 = arith.divf %205, %206 : vector<12x1xf32>
    %208 = vector.broadcast %207 : vector<12x1xf32> to vector<12x32xf32>
    %209 = arith.subf %203, %208 : vector<12x32xf32>
    %210 = arith.mulf %209, %209 : vector<12x32xf32>
    %cst_60 = arith.constant dense<0.000000e+00> : vector<12xf32>
    %211 = vector.multi_reduction <add>, %210, %cst_60 [1] : vector<12x32xf32> to vector<12xf32>
    %212 = vector.shape_cast %211 : vector<12xf32> to vector<12x1xf32>
    %cst_61 = arith.constant 3.200000e+01 : f32
    %213 = vector.broadcast %cst_61 : f32 to vector<12x1xf32>
    %214 = arith.divf %212, %213 : vector<12x1xf32>
    %215 = vector.broadcast %207 : vector<12x1xf32> to vector<12x32xf32>
    %216 = arith.subf %203, %215 : vector<12x32xf32>
    %cst_62 = arith.constant 9.99999997E-7 : f32
    %217 = vector.broadcast %cst_62 : f32 to vector<12x1xf32>
    %218 = arith.addf %214, %217 : vector<12x1xf32>
    %219 = math.rsqrt %218 : vector<12x1xf32>
    %220 = vector.broadcast %219 : vector<12x1xf32> to vector<12x32xf32>
    %221 = arith.mulf %216, %220 : vector<12x32xf32>
    %222 = vector.broadcast %124 : vector<1x32xf32> to vector<12x32xf32>
    %223 = arith.mulf %221, %222 : vector<12x32xf32>
    %224 = vector.broadcast %125 : vector<1x32xf32> to vector<12x32xf32>
    %225 = arith.addf %223, %224 : vector<12x32xf32>
    %226 = arith.truncf %225 : vector<12x32xf32> to vector<12x32xbf16>
    %c0_63 = arith.constant 0 : index
    %c0_64 = arith.constant 0 : index
    %c0_65 = arith.constant 0 : index
    %227 = vector.load %arg5[%c0_63, %c0_64, %c0_65] : memref<2x32x128xbf16, #tpu.memory_space<vmem>>, vector<1x32x128xbf16>
    %228 = vector.shape_cast %227 : vector<1x32x128xbf16> to vector<32x128xbf16>
    %cst_66 = arith.constant dense<0.000000e+00> : vector<12x128xf32>
    %229 = tpu.matmul %226, %228, %cst_66 {dimension_numbers = #tpu.dot_dimension_numbers<[1], [0], [0], [1], [0, 0, 1, 1], [], []>} : vector<12x32xbf16>, vector<32x128xbf16>, vector<12x128xf32> -> vector<12x128xf32>
    %230 = vector.broadcast %126 : vector<1x128xf32> to vector<12x128xf32>
    %231 = arith.addf %229, %230 : vector<12x128xf32>
    %232 = arith.mulf %231, %231 : vector<12x128xf32>
    %233 = arith.mulf %231, %232 : vector<12x128xf32>
    %cst_67 = arith.constant 4.471500e-02 : f32
    %234 = vector.broadcast %cst_67 : f32 to vector<12x128xf32>
    %235 = arith.mulf %234, %233 : vector<12x128xf32>
    %236 = arith.addf %231, %235 : vector<12x128xf32>
    %cst_68 = arith.constant 0.797884583 : f32
    %237 = vector.broadcast %cst_68 : f32 to vector<12x128xf32>
    %238 = arith.mulf %237, %236 : vector<12x128xf32>
    %239 = math.tanh %238 : vector<12x128xf32>
    %cst_69 = arith.constant 1.000000e+00 : f32
    %240 = vector.broadcast %cst_69 : f32 to vector<12x128xf32>
    %241 = arith.addf %240, %239 : vector<12x128xf32>
    %cst_70 = arith.constant 5.000000e-01 : f32
    %242 = vector.broadcast %cst_70 : f32 to vector<12x128xf32>
    %243 = arith.mulf %242, %241 : vector<12x128xf32>
    %244 = arith.mulf %231, %243 : vector<12x128xf32>
    %245 = arith.truncf %244 : vector<12x128xf32> to vector<12x128xbf16>
    %c0_71 = arith.constant 0 : index
    %c0_72 = arith.constant 0 : index
    %c0_73 = arith.constant 0 : index
    %246 = vector.load %arg6[%c0_71, %c0_72, %c0_73] : memref<2x128x32xbf16, #tpu.memory_space<vmem>>, vector<1x128x32xbf16>
    %247 = vector.shape_cast %246 : vector<1x128x32xbf16> to vector<128x32xbf16>
    %cst_74 = arith.constant dense<0.000000e+00> : vector<12x32xf32>
    %248 = tpu.matmul %245, %247, %cst_74 {dimension_numbers = #tpu.dot_dimension_numbers<[1], [0], [0], [1], [0, 0, 1, 1], [], []>} : vector<12x128xbf16>, vector<128x32xbf16>, vector<12x32xf32> -> vector<12x32xf32>
    %249 = vector.broadcast %127 : vector<1x32xf32> to vector<12x32xf32>
    %250 = arith.addf %248, %249 : vector<12x32xf32>
    %251 = arith.addf %203, %250 : vector<12x32xf32>
    %c1 = arith.constant 1 : index
    %c0_75 = arith.constant 0 : index
    %c0_76 = arith.constant 0 : index
    %252 = vector.load %arg7[%c1, %c0_75, %c0_76] : memref<2x8x128xf32, #tpu.memory_space<vmem>>, vector<1x8x128xf32>
    %253 = vector.shape_cast %252 : vector<1x8x128xf32> to vector<8x128xf32>
    %254 = vector.extract_strided_slice %253 {offsets = [0, 0], sizes = [1, 32], strides = [1, 1]} : vector<8x128xf32> to vector<1x32xf32>
    %255 = vector.extract_strided_slice %253 {offsets = [1, 0], sizes = [1, 32], strides = [1, 1]} : vector<8x128xf32> to vector<1x32xf32>
    %256 = vector.extract_strided_slice %253 {offsets = [2, 0], sizes = [1, 96], strides = [1, 1]} : vector<8x128xf32> to vector<1x96xf32>
    %257 = vector.extract_strided_slice %253 {offsets = [3, 0], sizes = [1, 32], strides = [1, 1]} : vector<8x128xf32> to vector<1x32xf32>
    %258 = vector.extract_strided_slice %253 {offsets = [4, 0], sizes = [1, 32], strides = [1, 1]} : vector<8x128xf32> to vector<1x32xf32>
    %259 = vector.extract_strided_slice %253 {offsets = [5, 0], sizes = [1, 32], strides = [1, 1]} : vector<8x128xf32> to vector<1x32xf32>
    %260 = vector.extract_strided_slice %253 {offsets = [6, 0], sizes = [1, 128], strides = [1, 1]} : vector<8x128xf32> to vector<1x128xf32>
    %261 = vector.extract_strided_slice %253 {offsets = [7, 0], sizes = [1, 32], strides = [1, 1]} : vector<8x128xf32> to vector<1x32xf32>
    %cst_77 = arith.constant dense<0.000000e+00> : vector<12xf32>
    %262 = vector.multi_reduction <add>, %251, %cst_77 [1] : vector<12x32xf32> to vector<12xf32>
    %263 = vector.shape_cast %262 : vector<12xf32> to vector<12x1xf32>
    %cst_78 = arith.constant 3.200000e+01 : f32
    %264 = vector.broadcast %cst_78 : f32 to vector<12x1xf32>
    %265 = arith.divf %263, %264 : vector<12x1xf32>
    %266 = vector.broadcast %265 : vector<12x1xf32> to vector<12x32xf32>
    %267 = arith.subf %251, %266 : vector<12x32xf32>
    %268 = arith.mulf %267, %267 : vector<12x32xf32>
    %cst_79 = arith.constant dense<0.000000e+00> : vector<12xf32>
    %269 = vector.multi_reduction <add>, %268, %cst_79 [1] : vector<12x32xf32> to vector<12xf32>
    %270 = vector.shape_cast %269 : vector<12xf32> to vector<12x1xf32>
    %cst_80 = arith.constant 3.200000e+01 : f32
    %271 = vector.broadcast %cst_80 : f32 to vector<12x1xf32>
    %272 = arith.divf %270, %271 : vector<12x1xf32>
    %273 = vector.broadcast %265 : vector<12x1xf32> to vector<12x32xf32>
    %274 = arith.subf %251, %273 : vector<12x32xf32>
    %cst_81 = arith.constant 9.99999997E-7 : f32
    %275 = vector.broadcast %cst_81 : f32 to vector<12x1xf32>
    %276 = arith.addf %272, %275 : vector<12x1xf32>
    %277 = math.rsqrt %276 : vector<12x1xf32>
    %278 = vector.broadcast %277 : vector<12x1xf32> to vector<12x32xf32>
    %279 = arith.mulf %274, %278 : vector<12x32xf32>
    %280 = vector.broadcast %254 : vector<1x32xf32> to vector<12x32xf32>
    %281 = arith.mulf %279, %280 : vector<12x32xf32>
    %282 = vector.broadcast %255 : vector<1x32xf32> to vector<12x32xf32>
    %283 = arith.addf %281, %282 : vector<12x32xf32>
    %284 = arith.truncf %283 : vector<12x32xf32> to vector<12x32xbf16>
    %c1_82 = arith.constant 1 : index
    %c0_83 = arith.constant 0 : index
    %c0_84 = arith.constant 0 : index
    %285 = vector.load %arg3[%c1_82, %c0_83, %c0_84] : memref<2x32x96xbf16, #tpu.memory_space<vmem>>, vector<1x32x96xbf16>
    %286 = vector.shape_cast %285 : vector<1x32x96xbf16> to vector<32x96xbf16>
    %cst_85 = arith.constant dense<0.000000e+00> : vector<12x96xf32>
    %287 = tpu.matmul %284, %286, %cst_85 {dimension_numbers = #tpu.dot_dimension_numbers<[1], [0], [0], [1], [0, 0, 1, 1], [], []>} : vector<12x32xbf16>, vector<32x96xbf16>, vector<12x96xf32> -> vector<12x96xf32>
    %288 = vector.broadcast %256 : vector<1x96xf32> to vector<12x96xf32>
    %289 = arith.addf %287, %288 : vector<12x96xf32>
    %290 = vector.extract_strided_slice %289 {offsets = [0, 0], sizes = [12, 32], strides = [1, 1]} : vector<12x96xf32> to vector<12x32xf32>
    %291 = vector.extract_strided_slice %289 {offsets = [0, 32], sizes = [12, 32], strides = [1, 1]} : vector<12x96xf32> to vector<12x32xf32>
    %292 = vector.extract_strided_slice %289 {offsets = [0, 64], sizes = [12, 32], strides = [1, 1]} : vector<12x96xf32> to vector<12x32xf32>
    %293 = vector.extract_strided_slice %290 {offsets = [0, 0], sizes = [12, 8], strides = [1, 1]} : vector<12x32xf32> to vector<12x8xf32>
    %294 = vector.extract_strided_slice %290 {offsets = [0, 8], sizes = [12, 8], strides = [1, 1]} : vector<12x32xf32> to vector<12x8xf32>
    %295 = vector.extract_strided_slice %290 {offsets = [0, 16], sizes = [12, 8], strides = [1, 1]} : vector<12x32xf32> to vector<12x8xf32>
    %296 = vector.extract_strided_slice %290 {offsets = [0, 24], sizes = [12, 8], strides = [1, 1]} : vector<12x32xf32> to vector<12x8xf32>
    %297 = tpu.concatenate %293, %294, %295, %296 in 0 : vector<12x8xf32>, vector<12x8xf32>, vector<12x8xf32>, vector<12x8xf32> -> vector<48x8xf32>
    %298 = vector.extract_strided_slice %291 {offsets = [0, 0], sizes = [12, 8], strides = [1, 1]} : vector<12x32xf32> to vector<12x8xf32>
    %299 = vector.extract_strided_slice %291 {offsets = [0, 8], sizes = [12, 8], strides = [1, 1]} : vector<12x32xf32> to vector<12x8xf32>
    %300 = vector.extract_strided_slice %291 {offsets = [0, 16], sizes = [12, 8], strides = [1, 1]} : vector<12x32xf32> to vector<12x8xf32>
    %301 = vector.extract_strided_slice %291 {offsets = [0, 24], sizes = [12, 8], strides = [1, 1]} : vector<12x32xf32> to vector<12x8xf32>
    %302 = tpu.concatenate %298, %299, %300, %301 in 0 : vector<12x8xf32>, vector<12x8xf32>, vector<12x8xf32>, vector<12x8xf32> -> vector<48x8xf32>
    %303 = vector.extract_strided_slice %292 {offsets = [0, 0], sizes = [12, 8], strides = [1, 1]} : vector<12x32xf32> to vector<12x8xf32>
    %304 = vector.extract_strided_slice %292 {offsets = [0, 8], sizes = [12, 8], strides = [1, 1]} : vector<12x32xf32> to vector<12x8xf32>
    %305 = vector.extract_strided_slice %292 {offsets = [0, 16], sizes = [12, 8], strides = [1, 1]} : vector<12x32xf32> to vector<12x8xf32>
    %306 = vector.extract_strided_slice %292 {offsets = [0, 24], sizes = [12, 8], strides = [1, 1]} : vector<12x32xf32> to vector<12x8xf32>
    %307 = tpu.concatenate %303, %304, %305, %306 in 0 : vector<12x8xf32>, vector<12x8xf32>, vector<12x8xf32>, vector<12x8xf32> -> vector<48x8xf32>
    %308 = arith.truncf %297 : vector<48x8xf32> to vector<48x8xbf16>
    %309 = arith.truncf %302 : vector<48x8xf32> to vector<48x8xbf16>
    %cst_86 = arith.constant dense<0.000000e+00> : vector<48x48xf32>
    %310 = tpu.matmul %308, %309, %cst_86 {dimension_numbers = #tpu.dot_dimension_numbers<[1], [1], [0], [0], [0, 0, 1, 0], [], []>} : vector<48x8xbf16>, vector<48x8xbf16>, vector<48x48xf32> -> vector<48x48xf32>
    %311 = arith.addf %310, %117 : vector<48x48xf32>
    %cst_87 = arith.constant dense<0xFF800000> : vector<48xf32>
    %312 = vector.multi_reduction <maximumf>, %311, %cst_87 [1] : vector<48x48xf32> to vector<48xf32>
    %313 = vector.shape_cast %312 : vector<48xf32> to vector<48x1xf32>
    %314 = vector.broadcast %313 : vector<48x1xf32> to vector<48x48xf32>
    %315 = arith.subf %311, %314 : vector<48x48xf32>
    %316 = math.exp %315 : vector<48x48xf32>
    %cst_88 = arith.constant dense<0.000000e+00> : vector<48xf32>
    %317 = vector.multi_reduction <add>, %316, %cst_88 [1] : vector<48x48xf32> to vector<48xf32>
    %318 = vector.shape_cast %317 : vector<48xf32> to vector<48x1xf32>
    %cst_89 = arith.constant 1.000000e+00 : f32
    %319 = vector.broadcast %cst_89 : f32 to vector<48x1xf32>
    %320 = arith.divf %319, %318 : vector<48x1xf32>
    %321 = vector.broadcast %320 : vector<48x1xf32> to vector<48x48xf32>
    %322 = arith.mulf %316, %321 : vector<48x48xf32>
    %323 = arith.truncf %322 : vector<48x48xf32> to vector<48x48xbf16>
    %324 = arith.truncf %307 : vector<48x8xf32> to vector<48x8xbf16>
    %cst_90 = arith.constant dense<0.000000e+00> : vector<48x8xf32>
    %325 = tpu.matmul %323, %324, %cst_90 {dimension_numbers = #tpu.dot_dimension_numbers<[1], [0], [0], [1], [0, 0, 1, 1], [], []>} : vector<48x48xbf16>, vector<48x8xbf16>, vector<48x8xf32> -> vector<48x8xf32>
    %326 = vector.extract_strided_slice %325 {offsets = [0, 0], sizes = [12, 8], strides = [1, 1]} : vector<48x8xf32> to vector<12x8xf32>
    %327 = vector.extract_strided_slice %325 {offsets = [12, 0], sizes = [12, 8], strides = [1, 1]} : vector<48x8xf32> to vector<12x8xf32>
    %328 = vector.extract_strided_slice %325 {offsets = [24, 0], sizes = [12, 8], strides = [1, 1]} : vector<48x8xf32> to vector<12x8xf32>
    %329 = vector.extract_strided_slice %325 {offsets = [36, 0], sizes = [12, 8], strides = [1, 1]} : vector<48x8xf32> to vector<12x8xf32>
    %330 = tpu.concatenate %326, %327, %328, %329 in 1 : vector<12x8xf32>, vector<12x8xf32>, vector<12x8xf32>, vector<12x8xf32> -> vector<12x32xf32>
    %331 = arith.truncf %330 : vector<12x32xf32> to vector<12x32xbf16>
    %c1_91 = arith.constant 1 : index
    %c0_92 = arith.constant 0 : index
    %c0_93 = arith.constant 0 : index
    %332 = vector.load %arg4[%c1_91, %c0_92, %c0_93] : memref<2x32x32xbf16, #tpu.memory_space<vmem>>, vector<1x32x32xbf16>
    %333 = vector.shape_cast %332 : vector<1x32x32xbf16> to vector<32x32xbf16>
    %cst_94 = arith.constant dense<0.000000e+00> : vector<12x32xf32>
    %334 = tpu.matmul %331, %333, %cst_94 {dimension_numbers = #tpu.dot_dimension_numbers<[1], [0], [0], [1], [0, 0, 1, 1], [], []>} : vector<12x32xbf16>, vector<32x32xbf16>, vector<12x32xf32> -> vector<12x32xf32>
    %335 = vector.broadcast %257 : vector<1x32xf32> to vector<12x32xf32>
    %336 = arith.addf %334, %335 : vector<12x32xf32>
    %337 = arith.addf %251, %336 : vector<12x32xf32>
    %cst_95 = arith.constant dense<0.000000e+00> : vector<12xf32>
    %338 = vector.multi_reduction <add>, %337, %cst_95 [1] : vector<12x32xf32> to vector<12xf32>
    %339 = vector.shape_cast %338 : vector<12xf32> to vector<12x1xf32>
    %cst_96 = arith.constant 3.200000e+01 : f32
    %340 = vector.broadcast %cst_96 : f32 to vector<12x1xf32>
    %341 = arith.divf %339, %340 : vector<12x1xf32>
    %342 = vector.broadcast %341 : vector<12x1xf32> to vector<12x32xf32>
    %343 = arith.subf %337, %342 : vector<12x32xf32>
    %344 = arith.mulf %343, %343 : vector<12x32xf32>
    %cst_97 = arith.constant dense<0.000000e+00> : vector<12xf32>
    %345 = vector.multi_reduction <add>, %344, %cst_97 [1] : vector<12x32xf32> to vector<12xf32>
    %346 = vector.shape_cast %345 : vector<12xf32> to vector<12x1xf32>
    %cst_98 = arith.constant 3.200000e+01 : f32
    %347 = vector.broadcast %cst_98 : f32 to vector<12x1xf32>
    %348 = arith.divf %346, %347 : vector<12x1xf32>
    %349 = vector.broadcast %341 : vector<12x1xf32> to vector<12x32xf32>
    %350 = arith.subf %337, %349 : vector<12x32xf32>
    %cst_99 = arith.constant 9.99999997E-7 : f32
    %351 = vector.broadcast %cst_99 : f32 to vector<12x1xf32>
    %352 = arith.addf %348, %351 : vector<12x1xf32>
    %353 = math.rsqrt %352 : vector<12x1xf32>
    %354 = vector.broadcast %353 : vector<12x1xf32> to vector<12x32xf32>
    %355 = arith.mulf %350, %354 : vector<12x32xf32>
    %356 = vector.broadcast %258 : vector<1x32xf32> to vector<12x32xf32>
    %357 = arith.mulf %355, %356 : vector<12x32xf32>
    %358 = vector.broadcast %259 : vector<1x32xf32> to vector<12x32xf32>
    %359 = arith.addf %357, %358 : vector<12x32xf32>
    %360 = arith.truncf %359 : vector<12x32xf32> to vector<12x32xbf16>
    %c1_100 = arith.constant 1 : index
    %c0_101 = arith.constant 0 : index
    %c0_102 = arith.constant 0 : index
    %361 = vector.load %arg5[%c1_100, %c0_101, %c0_102] : memref<2x32x128xbf16, #tpu.memory_space<vmem>>, vector<1x32x128xbf16>
    %362 = vector.shape_cast %361 : vector<1x32x128xbf16> to vector<32x128xbf16>
    %cst_103 = arith.constant dense<0.000000e+00> : vector<12x128xf32>
    %363 = tpu.matmul %360, %362, %cst_103 {dimension_numbers = #tpu.dot_dimension_numbers<[1], [0], [0], [1], [0, 0, 1, 1], [], []>} : vector<12x32xbf16>, vector<32x128xbf16>, vector<12x128xf32> -> vector<12x128xf32>
    %364 = vector.broadcast %260 : vector<1x128xf32> to vector<12x128xf32>
    %365 = arith.addf %363, %364 : vector<12x128xf32>
    %366 = arith.mulf %365, %365 : vector<12x128xf32>
    %367 = arith.mulf %365, %366 : vector<12x128xf32>
    %cst_104 = arith.constant 4.471500e-02 : f32
    %368 = vector.broadcast %cst_104 : f32 to vector<12x128xf32>
    %369 = arith.mulf %368, %367 : vector<12x128xf32>
    %370 = arith.addf %365, %369 : vector<12x128xf32>
    %cst_105 = arith.constant 0.797884583 : f32
    %371 = vector.broadcast %cst_105 : f32 to vector<12x128xf32>
    %372 = arith.mulf %371, %370 : vector<12x128xf32>
    %373 = math.tanh %372 : vector<12x128xf32>
    %cst_106 = arith.constant 1.000000e+00 : f32
    %374 = vector.broadcast %cst_106 : f32 to vector<12x128xf32>
    %375 = arith.addf %374, %373 : vector<12x128xf32>
    %cst_107 = arith.constant 5.000000e-01 : f32
    %376 = vector.broadcast %cst_107 : f32 to vector<12x128xf32>
    %377 = arith.mulf %376, %375 : vector<12x128xf32>
    %378 = arith.mulf %365, %377 : vector<12x128xf32>
    %379 = arith.truncf %378 : vector<12x128xf32> to vector<12x128xbf16>
    %c1_108 = arith.constant 1 : index
    %c0_109 = arith.constant 0 : index
    %c0_110 = arith.constant 0 : index
    %380 = vector.load %arg6[%c1_108, %c0_109, %c0_110] : memref<2x128x32xbf16, #tpu.memory_space<vmem>>, vector<1x128x32xbf16>
    %381 = vector.shape_cast %380 : vector<1x128x32xbf16> to vector<128x32xbf16>
    %cst_111 = arith.constant dense<0.000000e+00> : vector<12x32xf32>
    %382 = tpu.matmul %379, %381, %cst_111 {dimension_numbers = #tpu.dot_dimension_numbers<[1], [0], [0], [1], [0, 0, 1, 1], [], []>} : vector<12x128xbf16>, vector<128x32xbf16>, vector<12x32xf32> -> vector<12x32xf32>
    %383 = vector.broadcast %261 : vector<1x32xf32> to vector<12x32xf32>
    %384 = arith.addf %382, %383 : vector<12x32xf32>
    %385 = arith.addf %337, %384 : vector<12x32xf32>
    %c0_112 = arith.constant 0 : index
    %c0_113 = arith.constant 0 : index
    %386 = vector.load %arg8[%c0_112, %c0_113] : memref<12x32xf32, #tpu.memory_space<vmem>>, vector<12x32xf32>
    tpu.vector_store %arg8[%c0_112, %c0_113], %385 {strides = array<i32>} : memref<12x32xf32, #tpu.memory_space<vmem>>, vector<12x32xf32>,
    return
  }
}

</mosaic_0001>

<bundles_post_ra>
// kernel: front_model.1
= control target key start
LH: loop header
LB: loop body
LE: loop exit
PB: predicated region body
PF: predicated region fallthrough
CT: control target
= control target key end

     0   :  { %vm211_vm0 = vcmask 256001   ;;  %v64_v20 = vlaneseq  ;;  %vm3140_vm1 = vcmask 257024   ;;  %vm223_vm2 = vcmask 261124   ;;  %s2466_s22 = smov 120   ;;  %s2467_s23 = smov 104   ;;  %s3131_s1 = inlined_call_operand.vmem [shape: bf16[256,32], index: 1, kind: input, shape index: {}]   ;;  %s3132_s0 = inlined_call_operand.vmem [shape: bf16[8,256], index: 0, kind: input, shape index: {}]   ;;  %s3133_s2 = inlined_call_operand.vmem [shape: f32[7,32], index: 2, kind: input, shape index: {}]   ;;  %s3134_s3 = inlined_call_operand.vmem [shape: bf16[2,32,96], index: 3, kind: input, shape index: {}]   ;;  %s3135_s7 = inlined_call_operand.vmem [shape: f32[2,8,128], index: 7, kind: input, shape index: {}]   ;;  %s3136_s4 = inlined_call_operand.vmem [shape: bf16[2,32,32], index: 4, kind: input, shape index: {}]   ;;  %s3137_s5 = inlined_call_operand.vmem [shape: bf16[2,32,128], index: 5, kind: input, shape index: {}]   ;;  %s3138_s6 = inlined_call_operand.vmem [shape: bf16[2,128,32], index: 6, kind: input, shape index: {}]   ;;  %s3139_s8 = inlined_call_operand.vmem [shape: f32[12,32], index: 8, kind: output, shape index: {}]  }
   0x1   :  { %v2346_v0 = vld [vmem:[%s3131_s1 + $0x40] sm:$0xff]   ;;  %v2348_v2 = vld [vmem:[%s3131_s1 + $0x48] sm:$0xff]   ;;  %v2350_v4 = vld [vmem:[%s3131_s1 + $0x50] sm:$0xff]   ;;  %vm3141_vm3 = vcmask 261120   ;;  %v2464_v49 = vmov 0.0   ;;  %vm3144_vm4 = vmmov 0  }
   0x2   :  { %v2347_v1 = vld [vmem:[%s3131_s1] sm:$0xff]   ;;  %2053 = vmatprep.subr.bf16.mxu0 %v2346_v0  ;;  %v2349_v3 = vld [vmem:[%s3131_s1 + $0x8] sm:$0xff]   ;;  %v2351_v5 = vld [vmem:[%s3131_s1 + $0x10] sm:$0xff]   ;;  %v2575_v21 = vshrl.u32 %v64_v20, 7  ;;  %2135 = vmatprep.subr.bf16.mxu1 %v2464_v49  ;;  %vm3143_vm5 = vcmask 1043456   ;;  %s2468_s24 = smov 112  }
   0x3   :  { %2054 = vmatpush3.bf16.msra.mxu0 %v2347_v1  ;;  %v2352_v6 = vld [vmem:[%s3131_s1 + $0x58] sm:$0xff]   ;;  %v2354_v8 = vld [vmem:[%s3131_s1 + $0x60] sm:$0xff]   ;;  %v2356_v10 = vld [vmem:[%s3131_s1 + $0x68] sm:$0xff]   ;;  %2139 = vmatprep.mubr.msk.bf16.mxu1 %vm3144_vm4, %v2464_v49  ;;  %s2469_s25 = smov 96   ;;  %vm3142_vm6 = vcmask 64512   ;;  %s2471_s26 = smov 64  }
   0x4   :  { %2055 = vmatprep.subr.bf16.mxu0 %v2348_v2  ;;  %v2353_v7 = vld [vmem:[%s3131_s1 + $0x18] sm:$0xff]   ;;  %v2355_v9 = vld [vmem:[%s3131_s1 + $0x20] sm:$0xff]   ;;  %v2357_v13 = vld [vmem:[%s3131_s1 + $0x28] sm:$0xff]   ;;  %v2578_v22 = vsub.s32 0, %v2575_v21  ;;  %v577_v61 = vsub.s32 1, %v2575_v21  ;;  %vm242_vm7 = vcmp.lt.s32.totalorder %v2575_v21, 6 }
   0x5   :  { %v31_v11 = vld [vmem:[%s3132_s0] sm:$0xff]  ;;  %v2358_v14 = vld [vmem:[%s3131_s1 + $0x70] sm:$0xff]   ;;  %v2360_v16 = vld [vmem:[%s3131_s1 + $0x78] sm:$0xff]   ;;  %vm268_vm9 = vcmp.ge.s32.totalorder %v2575_v21, 6  ;;  %s2472_s9 = smov 8   ;;  %s2473_s10 = smov 16  }
   0x6   :  { %v1961_v12 = vcombine.high %v31_v11, %v31_v11  ;;  %v2359_v15 = vld [vmem:[%s3131_s1 + $0x30] sm:$0xff]   ;;  %v2361_v17 = vld [vmem:[%s3131_s1 + $0x38] sm:$0xff]   ;;  %v1960_v18 = vcombine.low %v31_v11, %v31_v11  ;;  %v30_v19 = vld [vmem:[%s3133_s2] sm:$0x7f]  ;;  %s2474_s11 = smov 24  }
   0x7   :  { %2056 = vmatpush3.bf16.msra.mxu0 %v2349_v3  ;;  %212 = vst.msk [vmem:[#allocation2 - $0x1] sm:$0x6] %vm211_vm0, %v30_v19  ;;  %219 = vst.msk [vmem:[#allocation2 + $0x5] sm:$0x6] %vm211_vm0, %v30_v19  ;;  %v67_v24 = vrot.slane %v30_v19, %v2578_v22  ;;  %v214_v27 = vrot.slane %v30_v19, 3  ;;  %v220_v28 = vrot.slane %v30_v19, 7 }
   0x8   :  { %2057 = vmatprep.subr.bf16.mxu0 %v2350_v4  ;;  %203 = vmatprep.mubr.bf16.mxu0 %v1961_v12  ;;  %v2364_v48 = vld [vmem:[%s3134_s3] sm:$0xff]   ;;  %v2365_v50 = vld [vmem:[%s3134_s3 + $0x8] sm:$0xff]  }
   0x9   :  { %2136 = vmatpush3.bf16.msra.mxu1 %v2364_v48  ;;  %v2611_v57 = vld [vmem:[%s3135_s7] sm:$0xff]  ;;  %v3160_v48 = vmov 0 }
   0xa   :  { %2137 = vmatprep.subr.bf16.mxu1 %v2464_v49  ;;  %v572_v60 = vrot.slane %v2611_v57, %v2578_v22  ;;  %v578_v1 = vrot.slane %v2611_v57, %v577_v61 }
   0xb   :  { %2058 = vmatpush3.bf16.msra.mxu0 %v2351_v5 }
   0xc   :  { %2059 = vmatprep.subr.bf16.mxu0 %v2352_v6  ;;  %v588_v6 = vsub.s32 2, %v2575_v21 }
   0xd   :  { %2138 = vmatpush3.bf16.msra.mxu1 %v2365_v50  ;;  %v232_v50 = vadd.s32 32, %v2575_v21 }
   0xe   :  { %2143 = vmatprep.subr.bf16.mxu1 %v2464_v49 }
   0xf   :  { %2060 = vmatpush3.bf16.msra.mxu0 %v2353_v7  ;;  %v589_v7 = vrot.slane %v2611_v57, %v588_v6 }
  0x10   :  { %2061 = vmatprep.subr.bf16.mxu0 %v2354_v8 }
  0x13   :  { %2062 = vmatpush3.bf16.msra.mxu0 %v2355_v9 }
  0x14   :  { %2063 = vmatprep.subr.bf16.mxu0 %v2356_v10 }
  0x17   :  { %2064 = vmatpush3.bf16.msra.mxu0 %v2357_v13 }
  0x18   :  { %2065 = vmatprep.subr.bf16.mxu0 %v2358_v14 }
  0x1b   :  { %2066 = vmatpush3.bf16.msra.mxu0 %v2359_v15 }
  0x1c   :  { %2067 = vmatprep.subr.bf16.mxu0 %v2360_v16 }
  0x1f   :  { %2068 = vmatpush3.bf16.msra.mxu0 %v2361_v17 }
  0x20   :  { %2161 = vmatprep.subr.bf16.mxu0 %v2464_v49 }
  0x22   :  { %204 = vmatmul.mubr.bf16.vlgmr.msra.gmra.mrb[0].mxu0 %v1960_v18 }
  0x23   :  { %2167 = vmatprep.mubr.msk.bf16.mxu0 %vm3144_vm4, %v2464_v49 }
  0xf5   :  { %v2069_v23 = vpop.f32.mrb[0].mxu0 }
  0xf6   :  { %v2070_v25 = vpop.f32.mrb[1].mxu0 }
  0xf7   :  { %v2071_v26 = vadd.f32 %v2070_v25, %v2069_v23  ;;  %v2072_v29 = vpop.f32.mrb[2].mxu0 }
  0xf8   :  { %v2073_v30 = vpop.f32.mrb[3].mxu0 }
  0xf9   :  { %v206_v31 = vadd.f32 %v2071_v26, %v67_v24 }
  0xfb   :  { %v216_v32 = vadd.f32 %v214_v27, %v206_v31  ;;  %v222_v33 = vadd.f32 %v220_v28, %v206_v31 }
  0xfd   :  { %218 = vst.msk [vmem:[#allocation2 + $0x2] sm:$0xf] %vm3140_vm1, %v216_v32 }
  0xfe   :  { %224 = vst.msk [vmem:[#allocation2 + $0x4] sm:$0xf0] %vm223_vm2, %v222_v33 }
 0x104   :  { %v2582_v34 = vld [vmem:[#allocation2] sm:$0xff] }
 0x105   :  { %v542_v35 = vsel %vm3141_vm3, %v2582_v34, 0.0  ;;  %v2586_v36 = vld [vmem:[#allocation2 + $0x8] sm:$0xf] }
 0x106   :  { %543 = vadd.xlane.f32.xlu0 %v542_v35  ;;  %v545_v37 = vsel %vm3140_vm1, %v2586_v36, 0.0 }
 0x10a   :  { %546 = vadd.xlane.f32.xlu0 %v545_v37 }
 0x193   :  { %v544_v38 = vpop.xlane.xlu0 %543 }
 0x194   :  { %v549_v39 = vmul.f32 0.03125, %v544_v38 }
 0x196   :  { %v551_v40 = vsub.f32 %v2582_v34, %v549_v39 }
 0x197   :  { %v547_v41 = vpop.xlane.xlu0 %546 }
 0x198   :  { %v550_v42 = vmul.f32 0.03125, %v547_v41  ;;  %v553_v43 = vmul.f32 %v551_v40, %v551_v40  ;;  %v2665_v41 = vand.u32 127, %v64_v20  ;;  %v230_v20 = vadd.s32 16, %v2575_v21 }
 0x19a   :  { %v552_v44 = vsub.f32 %v2586_v36, %v550_v42  ;;  %v555_v45 = vsel %vm3141_vm3, %v553_v43, 0.0  ;;  %v229_v42 = vadd.s32 8, %v2575_v21  ;;  %vm261_vm8 = vcmp.lt.s32.totalorder %v2665_v41, 6 }
 0x19b   :  { %556 = vadd.xlane.f32.xlu1 %v555_v45  ;;  %vm286_vm10 = vcmp.ge.s32.totalorder %v2665_v41, 6  ;;  %vm2672_vm12 = vmand %vm242_vm7, %vm261_vm8  ;;  %v3152_v43 = vmov 0  ;;  %vm324_vm14 = vcmp.ge.s32.totalorder %v2665_v41, 12  ;;  %vm293_vm0 = vcmp.lt.s32.totalorder %v2665_v41, 12 }
 0x19c   :  { %v554_v46 = vmul.f32 %v552_v44, %v552_v44  ;;  %vm275_vm11 = vcmp.lt.s32.totalorder %v229_v42, 12  ;;  %v3153_v43 = vsel %vm2672_vm12, 4294967295, %v3152_v43  ;;  %vm307_vm13 = vcmp.ge.s32.totalorder %v229_v42, 12  ;;  %vm287_vm15 = vmand %vm268_vm9, %vm286_vm10 }
 0x19d   :  { %vm288_vm2 = vmand %vm275_vm11, %vm286_vm10  ;;  %vm314_vm7 = vcmp.lt.s32.totalorder %v230_v20, 18  ;;  %v3156_v45 = vmov 0  ;;  %vm346_vm11 = vcmp.ge.s32.totalorder %v230_v20, 18  ;;  %vm369_vm10 = vcmp.lt.s32.totalorder %v2665_v41, 24 }
 0x19e   :  { %v558_v47 = vsel %vm3140_vm1, %v554_v46, 0.0  ;;  %vm326_vm1 = vmand %vm307_vm13, %vm324_vm14  ;;  %v231_v46 = vadd.s32 24, %v2575_v21  ;;  %vm362_vm13 = vcmp.ge.s32.totalorder %v2665_v41, 18  ;;  %vm407_vm12 = vcmp.lt.s32.totalorder %v2665_v41, 30 }
 0x19f   :  { %559 = vadd.xlane.f32.xlu1 %v558_v47  ;;  %vm2684_vm8 = vmand %vm288_vm2, %vm293_vm0  ;;  %v3158_v47 = vmov 0 }
 0x1a0   :  { %v3157_v45 = vsel %vm2684_vm8, 4294967295, %v3156_v45  ;;  %vm327_vm9 = vmand %vm314_vm7, %vm324_vm14  ;;  %vm423_vm14 = vcmp.ge.s32.totalorder %v231_v46, 30  ;;  %vm438_vm7 = vcmp.ge.s32.totalorder %v2665_v41, 30 }
 0x228   :  { %v557_v51 = vpop.xlane.xlu1 %556 }
 0x229   :  { %v561_v52 = vmul.f32 0.03125, %v557_v51  ;;  %v2470_v51 = vmov -1e+30  }
 0x22b   :  { %v563_v53 = vadd.f32 1e-06, %v561_v52 }
 0x22c   :  { %v560_v54 = vpop.xlane.xlu1 %559 }
 0x22d   :  { %2392 = vrsqrt.f32 %v563_v53  ;;  %v562_v55 = vmul.f32 0.03125, %v560_v54 }
 0x22f   :  { %v564_v56 = vadd.f32 1e-06, %v562_v55  ;;  %v233_v55 = vadd.s32 40, %v2575_v21 }
 0x231   :  { %2394 = vrsqrt.f32 %v564_v56 }
 0x237   :  { %v2393_v58 = vpop.eup %2392 }
 0x238   :  { %v567_v59 = vmul.f32 %v2393_v58, %v551_v40 }
 0x23a   :  { %v573_v0 = vmul.f32 %v572_v60, %v567_v59 }
 0x23b   :  { %v2395_v62 = vpop.eup %2394 }
 0x23c   :  { %v568_v63 = vmul.f32 %v2395_v62, %v552_v44  ;;  %v579_v3 = vadd.f32 %v578_v1, %v573_v0  ;;  %v3154_v44 = vmov 0 }
 0x23e   :  { %v574_v2 = vmul.f32 %v572_v60, %v568_v63 }
 0x240   :  { %v580_v4 = vadd.f32 %v578_v1, %v574_v2 }
 0x242   :  { %v581_v5 = vpack.c.bf16 %v580_v4, %v579_v3  ;;  %v3175_v3 = vmov 0 }
 0x244   :  { %2140 = vmatmul.mubr.msk.bf16.vlgmr.msra.gmra.mrb[0].mxu1 %vm3141_vm3, %v581_v5  ;;  %vm331_vm3 = vcmp.lt.s32.totalorder %v2665_v41, 18 }
 0x245   :  { %2149 = vmatprep.mubr.msk.bf16.mxu1 %vm3144_vm4, %v2464_v49  ;;  %vm2703_vm2 = vmand %vm327_vm9, %vm331_vm3 }
 0x246   :  { %v3161_v48 = vsel %vm2703_vm2, 4294967295, %v3160_v48 }
 0x317   :  { %v639_v8 = vpop.f32.mrb[0].mxu1 }
 0x318   :  { %v640_v9 = vadd.f32 %v639_v8, %v589_v7  ;;  %v2141_v10 = vpop.f32.mrb[1].mxu1 }
 0x319   :  { %v642_v11 = vpop.f32.mrb[2].mxu1 }
 0x31a   :  { %v643_v12 = vadd.f32 %v642_v11, %v589_v7  ;;  %v2142_v13 = vpop.f32.mrb[3].mxu1  ;;  %v649_v14 = vrot.slane %v640_v9, 4 }
 0x31c   :  { %v650_v15 = vrot.slane %v643_v12, 4  ;;  %652 = vrot.lane.b32.xlu0 %v649_v14, %s2466_s22 }
 0x31e   :  { %v651_v16 = vsel %vm3143_vm5, %v649_v14, %v650_v15 }
 0x31f   :  { %v2306_v17 = vpack.i.bf16 %v651_v16, %v649_v14  ;;  %654 = vrot.lane.b32.xlu1 %v651_v16, %s2466_s22 }
 0x321   :  { %2307 = vrot.lane.b32.xlu0 %v2306_v17, %s2467_s23 }
 0x323   :  { %658 = vrot.lane.b32.xlu1 %v640_v9, %s2468_s24 }
 0x327   :  { %660 = vrot.lane.b32.xlu1 %v643_v12, %s2468_s24 }
 0x38e   :  { %v653_v18 = vpop.permute.xlu0 %652 }
 0x38f   :  { %v670_v19 = vsel %vm3143_vm5, %v643_v12, %v653_v18 }
 0x390   :  { %v2633_v23 = vpack.c.bf16 %v670_v19, %v640_v9 }
 0x391   :  { %v655_v24 = vpop.permute.xlu1 %654 }
 0x392   :  { %678 = vrot.lane.b32.xlu1 %v2633_v23, %s2469_s25 }
 0x393   :  { %v2308_v25 = vpop.permute.xlu0 %2307 }
 0x394   :  { %v2309_v28 = vunpack.i.l.bf16 %v2308_v25  ;;  %v2310_v29 = vunpack.i.h.bf16 %v2308_v25 }
 0x395   :  { %v659_v26 = vpop.permute.xlu1 %658 }
 0x396   :  { %v2637_v27 = vpack.c.bf16 %v659_v26, %v655_v24 }
 0x398   :  { %680 = vrot.lane.b32.xlu0 %v2637_v27, %s2469_s25 }
 0x399   :  { %v661_v30 = vpop.permute.xlu1 %660 }
 0x39a   :  { %v671_v31 = vsel %vm3143_vm5, %v661_v30, %v2309_v28  ;;  %vm2689_vm5 = vmand %vm326_vm1, %vm331_vm3  ;;  %vm400_vm1 = vcmp.ge.s32.totalorder %v2665_v41, 24  ;;  %vm3162_vm3 = vnez %v3153_v43 }
 0x39b   :  { %v2642_v32 = vpack.c.bf16 %v2310_v29, %v671_v31  ;;  %v3159_v47 = vsel %vm2689_vm5, 4294967295, %v3158_v47  ;;  %vm445_vm5 = vcmp.lt.s32.totalorder %v2665_v41, 36 }
 0x39d   :  { %682 = vrot.lane.b32.xlu1 %v2642_v32, %s2469_s25 }
 0x404   :  { %v679_v33 = vpop.permute.xlu1 %678 }
 0x405   :  { %v695_v35 = vsel %vm3142_vm6, %v679_v33, 0 }
 0x406   :  { %2144 = vmatpush3.bf16.xpose.msra.mxu1 %v695_v35 }
 0x407   :  { %2145 = vmatprep.subr.bf16.mxu1 %v2464_v49 }
 0x40a   :  { %v681_v37 = vpop.permute.xlu0 %680 }
 0x40b   :  { %v698_v38 = vsel %vm3142_vm6, %v681_v37, 0 }
 0x40e   :  { %2146 = vmatpush3.bf16.xpose.msra.mxu1 %v698_v38 }
 0x40f   :  { %2147 = vmatprep.subr.bf16.mxu1 %v2464_v49  ;;  %v683_v39 = vpop.permute.xlu1 %682 }
 0x410   :  { %v701_v40 = vsel %vm3142_vm6, %v683_v39, 0 }
 0x416   :  { %2148 = vmatpush3.bf16.xpose.msra.mxu1 %v701_v40 }
 0x417   :  { %2179 = vmatprep.subr.bf16.mxu1 %v2464_v49 }
 0x41d   :  { %2150 = vmatmul.mubr.msk.bf16.vlgmr.msra.gmra.mrb[4].mxu1 %vm3142_vm6, %v2633_v23 }
 0x41e   :  { %2153 = vmatprep.mubr.msk.bf16.mxu1 %vm3144_vm4, %v2464_v49 }
 0x425   :  { %2154 = vmatmul.mubr.msk.bf16.gmra.mrb[8].mxu1 %vm3142_vm6, %v2637_v27 }
 0x426   :  { %2157 = vmatprep.mubr.msk.bf16.mxu1 %vm3144_vm4, %v2464_v49 }
 0x42d   :  { %2158 = vmatmul.mubr.msk.bf16.gmra.mrb[12].mxu1 %vm3142_vm6, %v2642_v32  ;;  %vm2680_vm6 = vmand %vm287_vm15, %vm293_vm0  ;;  %vm391_vm0 = vcmp.lt.s32.totalorder %v231_v46, 30 }
 0x42e   :  { %2183 = vmatprep.mubr.msk.bf16.mxu1 %vm3144_vm4, %v2464_v49  ;;  %v3155_v44 = vsel %vm2680_vm6, 4294967295, %v3154_v44  ;;  %vm365_vm4 = vmand %vm346_vm11, %vm362_vm13  ;;  %vm430_vm11 = vcmp.lt.s32.totalorder %v232_v50, 36 }
 0x42f   :  { %vm404_vm6 = vmand %vm391_vm0, %vm400_vm1  ;;  %vm3163_vm9 = vnez %v3155_v44  ;;  %vm3169_vm0 = vnez %v3157_v45  ;;  %vm3170_vm1 = vnez %v3159_v47 }
 0x430   :  { %vm442_vm15 = vmand %vm423_vm14, %vm438_vm7 }
 0x431   :  { %vm3164_vm2 = vmor %vm3162_vm3, %vm3163_vm9  ;;  %vm462_vm3 = vcmp.ge.s32.totalorder %v232_v50, 36  ;;  %vm476_vm9 = vcmp.ge.s32.totalorder %v2665_v41, 36 }
 0x432   :  { %v2719_v52 = vsel %vm3164_vm2, 0.0, %v2470_v51  ;;  %vm2721_vm8 = vmand %vm365_vm4, %vm369_vm10  ;;  %vm3151_vm2 = vcmask 392192   ;;  %vm483_vm10 = vcmp.lt.s32.totalorder %v2665_v41, 42 }
 0x433   :  { %vm2725_vm13 = vmand %vm404_vm6, %vm407_vm12  ;;  %vm3174_vm12 = vnez %v3161_v48 }
 0x434   :  { %vm3171_vm14 = vmor %vm3169_vm0, %vm3170_vm1  ;;  %vm501_vm0 = vcmp.ge.s32.totalorder %v233_v55, 42  ;;  %vm514_vm1 = vcmp.ge.s32.totalorder %v2665_v41, 42 }
 0x435   :  { %v2735_v58 = vsel %vm3171_vm14, 0.0, %v2470_v51  ;;  %vm2739_vm4 = vmand %vm442_vm15, %vm445_vm5 }
 0x436   :  { %vm443_vm6 = vmand %vm430_vm11, %vm438_vm7  ;;  %vm469_vm7 = vcmp.lt.s32.totalorder %v233_v55, 42 }
 0x437   :  { %vm455_vm15 = vmor %vm2725_vm13, %vm2739_vm4 }
 0x438   :  { %vm2759_vm11 = vmand %vm443_vm6, %vm445_vm5  ;;  %vm521_vm6 = vcmp.lt.s32.totalorder %v2665_v41, 48  ;;  %v2778_v8 = vsel %vm455_vm15, 0.0, %v2470_v51 }
 0x439   :  { %v3176_v3 = vsel %vm2759_vm11, 4294967295, %v3175_v3  ;;  %vm481_vm14 = vmand %vm462_vm3, %vm476_vm9 }
 0x43a   :  { %vm3177_vm13 = vmor %vm3174_vm12, %vm2721_vm8  ;;  %vm3178_vm8 = vcmask 392192   ;;  %vm3179_vm12 = vnez %v3176_v3 }
 0x43b   :  { %v2773_v5 = vsel %vm3177_vm13, 0.0, %v2470_v51  ;;  %vm482_vm5 = vmand %vm469_vm7, %vm476_vm9 }
 0x43c   :  { %vm520_vm4 = vmand %vm501_vm0, %vm514_vm1 }
 0x43d   :  { %vm488_vm3 = vmand %vm481_vm14, %vm483_vm10 }
 0x43e   :  { %vm527_vm11 = vmand %vm520_vm4, %vm521_vm6  ;;  %vm3190_vm6 = vmmov 0  }
 0x43f   :  { %vm494_vm9 = vmor %vm3179_vm12, %vm488_vm3  ;;  %vm3193_vm12 = vcmask 1043456  }
 0x440   :  { %v2785_v15 = vsel %vm494_vm9, 0.0, %v2470_v51  ;;  %vm3180_vm15 = vmmov %vm3178_vm8 }
 0x441   :  { %vm3182_vm0 = vmmov %vm3178_vm8 }
 0x442   :  { %vm3185_vm1 = vmmov %vm3182_vm0 }
 0x443   :  { %vm3186_vm14 = vmmov %vm3182_vm0 }
 0x444   :  { %vm3187_vm13 = vmmov %vm3182_vm0 }
 0x445   :  { %vm3189_vm4 = vmmov %vm3182_vm0 }
 0x446   :  { %vm3191_vm3 = vmmov %vm3182_vm0 }
 0x447   :  { %vm3194_vm9 = vmmov %vm3193_vm12 }
 0x4f0   :  { %v737_v56 = vpop.f32.mrb[4].mxu1 }
 0x4f1   :  { %v738_v60 = vadd.f32 %v737_v56, %v2719_v52  ;;  %v2151_v62 = vpop.f32.mrb[5].mxu1 }
 0x4f2   :  { %v740_v63 = vpop.f32.mrb[6].mxu1 }
 0x4f3   :  { %v741_v0 = vadd.f32 %v740_v63, %v2735_v58  ;;  %v2152_v1 = vpop.f32.mrb[7].mxu1  ;;  %v761_v2 = vsel %vm3151_vm2, %v738_v60, -inf }
 0x4f4   :  { %762 = vmax.xlane.f32.xlu0 %v761_v2 }
 0x4f5   :  { %v764_v4 = vsel %vm3151_vm2, %v741_v0, -inf  ;;  %vm489_vm2 = vmand %vm482_vm5, %vm483_vm10 }
 0x4f6   :  { %765 = vmax.xlane.f32.xlu1 %v764_v4  ;;  %vm533_vm7 = vmor %vm489_vm2, %vm527_vm11 }
 0x4f7   :  { %v2788_v18 = vsel %vm533_vm7, 0.0, %v2470_v51  ;;  %vm3181_vm10 = vmmov %vm3178_vm8  ;;  %vm942_vm7 = vcmask 130048  }
 0x4f8   :  { %v745_v7 = vpop.f32.mrb[8].mxu1  ;;  %vm3183_vm2 = vmmov %vm3182_vm0 }
 0x4f9   :  { %v746_v9 = vadd.f32 %v745_v7, %v2773_v5  ;;  %v2155_v10 = vpop.f32.mrb[9].mxu1  ;;  %vm3184_vm11 = vmmov %vm3182_vm0 }
 0x4fa   :  { %v748_v11 = vpop.f32.mrb[10].mxu1  ;;  %vm3188_vm5 = vmmov %vm3182_vm0 }
 0x4fb   :  { %v749_v12 = vadd.f32 %v748_v11, %v2778_v8  ;;  %v2156_v13 = vpop.f32.mrb[11].mxu1  ;;  %v767_v14 = vsel %vm3178_vm8, %v746_v9, -inf  ;;  %vm3192_vm8 = vmmov %vm3182_vm0 }
 0x4fc   :  { %768 = vmax.xlane.f32.xlu0 %v767_v14 }
 0x4fd   :  { %v770_v16 = vsel %vm3180_vm15, %v749_v12, -inf  ;;  %vm945_vm15 = vcmask 195584  }
 0x500   :  { %771 = vmax.xlane.f32.xlu0 %v770_v16  ;;  %v753_v17 = vpop.f32.mrb[12].mxu1 }
 0x501   :  { %v754_v19 = vadd.f32 %v753_v17, %v2785_v15  ;;  %v2159_v24 = vpop.f32.mrb[13].mxu1 }
 0x502   :  { %v756_v25 = vpop.f32.mrb[14].mxu1 }
 0x503   :  { %v757_v26 = vadd.f32 %v756_v25, %v2788_v18  ;;  %v2160_v28 = vpop.f32.mrb[15].mxu1  ;;  %v773_v29 = vsel %vm3181_vm10, %v754_v19, -inf  ;;  %vm3195_vm10 = vcmask 64512  }
 0x504   :  { %774 = vmax.xlane.f32.xlu0 %v773_v29 }
 0x505   :  { %v776_v30 = vsel %vm3182_vm0, %v757_v26, -inf  ;;  %vm3196_vm0 = vmmov %vm3195_vm10 }
 0x506   :  { %777 = vmax.xlane.f32.xlu1 %v776_v30 }
 0x581   :  { %v763_v31 = vpop.xlane.xlu0 %762 }
 0x582   :  { %v779_v33 = vsub.f32 %v738_v60, %v763_v31 }
 0x583   :  { %v766_v35 = vpop.xlane.xlu1 %765 }
 0x584   :  { %v785_v37 = vmul.f32 1.442695, %v779_v33  ;;  %v780_v38 = vsub.f32 %v741_v0, %v766_v35 }
 0x586   :  { %2396 = vpow2.f32 %v785_v37  ;;  %v787_v39 = vmul.f32 1.442695, %v780_v38  ;;  %v2366_v38 = vld [vmem:[%s3136_s4] sm:$0xff]  }
 0x587   :  { %2180 = vmatpush3.bf16.msra.mxu1 %v2366_v38 }
 0x588   :  { %2398 = vpow2.f32 %v787_v39  ;;  %2181 = vmatprep.subr.bf16.mxu1 %v2464_v49 }
 0x589   :  { %v769_v40 = vpop.xlane.xlu0 %768 }
 0x58a   :  { %v781_v41 = vsub.f32 %v746_v9, %v769_v40 }
 0x58c   :  { %v789_v42 = vmul.f32 1.442695, %v781_v41 }
 0x58d   :  { %v772_v43 = vpop.xlane.xlu0 %771 }
 0x58e   :  { %2400 = vpow2.f32 %v789_v42  ;;  %v782_v20 = vsub.f32 %v749_v12, %v772_v43  ;;  %v2367_v43 = vld [vmem:[%s3136_s4 + $0x8] sm:$0xff]  }
 0x58f   :  { %2182 = vmatpush3.bf16.msra.mxu1 %v2367_v43 }
 0x590   :  { %v2397_v44 = vpop.eup %2396  ;;  %v791_v45 = vmul.f32 1.442695, %v782_v20  ;;  %2187 = vmatprep.subr.bf16.mxu1 %v2464_v49 }
 0x591   :  { %v775_v46 = vpop.xlane.xlu0 %774  ;;  %v797_v47 = vsel %vm3183_vm2, %v2397_v44, 0.0  ;;  %vm3197_vm2 = vcmask 261120  }
 0x592   :  { %v2399_v48 = vpop.eup %2398  ;;  %2402 = vpow2.f32 %v791_v45  ;;  %v783_v50 = vsub.f32 %v754_v19, %v775_v46  ;;  %798 = vadd.xlane.f32.xlu0 %v797_v47 }
 0x593   :  { %v800_v51 = vsel %vm3184_vm11, %v2399_v48, 0.0  ;;  %v778_v63 = vpop.xlane.xlu1 %777  ;;  %vm3198_vm11 = vmmov %vm3197_vm2 }
 0x594   :  { %v793_v53 = vmul.f32 1.442695, %v783_v50  ;;  %801 = vadd.xlane.f32.xlu1 %v800_v51  ;;  %v784_v0 = vsub.f32 %v757_v26, %v778_v63 }
 0x596   :  { %2404 = vpow2.f32 %v793_v53  ;;  %v795_v1 = vmul.f32 1.442695, %v784_v0 }
 0x598   :  { %v2401_v54 = vpop.eup %2400  ;;  %2406 = vpow2.f32 %v795_v1 }
 0x599   :  { %v803_v55 = vsel %vm3185_vm1, %v2401_v54, 0.0  ;;  %vm3199_vm1 = vcmask 257024  }
 0x59a   :  { %804 = vadd.xlane.f32.xlu0 %v803_v55 }
 0x59c   :  { %v2403_v56 = vpop.eup %2402 }
 0x59d   :  { %v806_v59 = vsel %vm3186_vm14, %v2403_v56, 0.0  ;;  %vm3200_vm14 = vmmov %vm3197_vm2 }
 0x59e   :  { %807 = vadd.xlane.f32.xlu1 %v806_v59 }
 0x5a0   :  { %v2405_v60 = vpop.eup %2404 }
 0x5a1   :  { %v809_v62 = vsel %vm3187_vm13, %v2405_v60, 0.0  ;;  %vm3201_vm13 = vmmov %vm3199_vm1 }
 0x5a2   :  { %810 = vadd.xlane.f32.xlu0 %v809_v62  ;;  %v2407_v2 = vpop.eup %2406 }
 0x5a3   :  { %v812_v3 = vsel %vm3188_vm5, %v2407_v2, 0.0  ;;  %vm3202_vm5 = vmmov %vm3197_vm2 }
 0x5af   :  { %838 = vrot.lane.b32.xlu1 %v2637_v27, %s2471_s26 }
 0x5b8   :  { %836 = vrot.lane.b32.xlu0 %v2633_v23, %s2471_s26 }
 0x5d3   :  { %813 = vadd.xlane.f32.xlu1 %v812_v3 }
 0x5e4   :  { %840 = vrot.lane.b32.xlu1 %v2642_v32, %s2471_s26 }
 0x61f   :  { %v799_v4 = vpop.xlane.xlu0 %798 }
 0x621   :  { %v802_v9 = vpop.xlane.xlu1 %801 }
 0x622   :  { %2408 = vrcp.f32 %v802_v9 }
 0x623   :  { %2410 = vrcp.f32 %v799_v4 }
 0x627   :  { %v805_v7 = vpop.xlane.xlu0 %804 }
 0x62b   :  { %v808_v11 = vpop.xlane.xlu1 %807 }
 0x62c   :  { %2412 = vrcp.f32 %v808_v11  ;;  %v2409_v12 = vpop.eup %2408 }
 0x62d   :  { %2414 = vrcp.f32 %v805_v7  ;;  %v2411_v32 = vpop.eup %2410  ;;  %v828_v14 = vmul.f32 %v2409_v12, %v2399_v48 }
 0x62e   :  { %v827_v16 = vmul.f32 %v2411_v32, %v2397_v44 }
 0x62f   :  { %v811_v10 = vpop.xlane.xlu0 %810  ;;  %v839_v23 = vpop.permute.xlu1 %838 }
 0x630   :  { %v833_v19 = vpack.c.bf16 %v828_v14, %v827_v16 }
 0x633   :  { %v837_v27 = vpop.permute.xlu0 %836 }
 0x634   :  { %2162 = vmatpush3.bf16.msra.mxu0 %v837_v27 }
 0x635   :  { %2163 = vmatprep.subr.bf16.mxu0 %v2464_v49 }
 0x636   :  { %v2413_v24 = vpop.eup %2412 }
 0x637   :  { %v2415_v25 = vpop.eup %2414  ;;  %v830_v26 = vmul.f32 %v2413_v24, %v2403_v56 }
 0x638   :  { %2164 = vmatpush3.bf16.msra.mxu0 %v839_v23  ;;  %v829_v28 = vmul.f32 %v2415_v25, %v2401_v54 }
 0x639   :  { %2165 = vmatprep.subr.bf16.mxu0 %v2464_v49 }
 0x63a   :  { %v834_v29 = vpack.c.bf16 %v830_v26, %v829_v28 }
 0x660   :  { %v814_v13 = vpop.xlane.xlu1 %813 }
 0x661   :  { %2416 = vrcp.f32 %v814_v13 }
 0x662   :  { %2418 = vrcp.f32 %v811_v10 }
 0x664   :  { %v841_v17 = vpop.permute.xlu1 %840 }
 0x665   :  { %2166 = vmatpush3.bf16.msra.mxu0 %v841_v17 }
 0x666   :  { %2195 = vmatprep.subr.bf16.mxu0 %v2464_v49 }
 0x668   :  { %2168 = vmatmul.mubr.msk.bf16.vlgmr.msra.gmra.mrb[4].mxu0 %vm3189_vm4, %v833_v19  ;;  %v955_v19 = vsub.s32 3, %v2575_v21  ;;  %vm3203_vm4 = vmmov %vm3197_vm2 }
 0x669   :  { %2171 = vmatprep.mubr.msk.bf16.mxu0 %vm3190_vm6, %v2464_v49 }
 0x66a   :  { %v956_v24 = vrot.slane %v2611_v57, %v955_v19 }
 0x66b   :  { %v2417_v30 = vpop.eup %2416 }
 0x66c   :  { %v2419_v31 = vpop.eup %2418  ;;  %v832_v33 = vmul.f32 %v2417_v30, %v2407_v2 }
 0x66d   :  { %v831_v35 = vmul.f32 %v2419_v31, %v2405_v60 }
 0x66f   :  { %v835_v37 = vpack.c.bf16 %v832_v33, %v831_v35 }
 0x670   :  { %2172 = vmatmul.mubr.msk.bf16.gmra.mrb[8].mxu0 %vm3191_vm3, %v834_v29  ;;  %vm3204_vm3 = vmmov %vm3199_vm1 }
 0x671   :  { %2175 = vmatprep.mubr.msk.bf16.mxu0 %vm3190_vm6, %v2464_v49 }
 0x678   :  { %2176 = vmatmul.mubr.msk.bf16.gmra.mrb[12].mxu0 %vm3192_vm8, %v835_v37  ;;  %vm3205_vm8 = vmmov %vm3197_vm2 }
 0x679   :  { %2211 = vmatprep.mubr.msk.bf16.mxu0 %vm3190_vm6, %v2464_v49 }
 0x73b   :  { %v888_v39 = vpop.f32.mrb[4].mxu0 }
 0x73c   :  { %v2169_v40 = vpop.f32.mrb[5].mxu0 }
 0x73d   :  { %v891_v41 = vpop.f32.mrb[6].mxu0 }
 0x73e   :  { %v2170_v42 = vpop.f32.mrb[7].mxu0  ;;  %v913_v44 = vrot.slane %v891_v41, 4 }
 0x743   :  { %v896_v20 = vpop.f32.mrb[8].mxu0 }
 0x744   :  { %v914_v45 = vrot.slane %v896_v20, 4  ;;  %v2173_v46 = vpop.f32.mrb[9].mxu0 }
 0x745   :  { %v899_v47 = vpop.f32.mrb[10].mxu0  ;;  %v2368_v46 = vld [vmem:[%s3137_s5] sm:$0xff]  }
 0x746   :  { %v915_v48 = vsel %vm3193_vm12, %v913_v44, %v914_v45  ;;  %v2174_v50 = vpop.f32.mrb[11].mxu0  ;;  %vm3206_vm12 = vmmov %vm3199_vm1 }
 0x747   :  { %v2311_v51 = vpack.i.bf16 %v914_v45, %v915_v48 }
 0x749   :  { %2312 = vrot.lane.b32.xlu1 %v2311_v51, %s2472_s9 }
 0x74b   :  { %v904_v53 = vpop.f32.mrb[12].mxu0 }
 0x74c   :  { %v2316_v54 = vpack.i.bf16 %v904_v53, %v899_v47  ;;  %v2177_v55 = vpop.f32.mrb[13].mxu0  ;;  %v931_v59 = vrot.slane %v904_v53, 4  ;;  %v2369_v47 = vld [vmem:[%s3137_s5 + $0x8] sm:$0xff]  }
 0x74d   :  { %v907_v56 = vpop.f32.mrb[14].mxu0 }
 0x74e   :  { %v932_v60 = vrot.slane %v907_v56, 4  ;;  %2317 = vrot.lane.b32.xlu0 %v2316_v54, %s2473_s10  ;;  %v2178_v62 = vpop.f32.mrb[15].mxu0  ;;  %v1043_v56 = vsub.s32 4, %v2575_v21 }
 0x750   :  { %v933_v63 = vsel %vm3194_vm9, %v931_v59, %v932_v60  ;;  %vm3207_vm9 = vmmov %vm3197_vm2 }
 0x751   :  { %v2321_v0 = vpack.i.bf16 %v932_v60, %v933_v63  ;;  %v1044_v60 = vrot.slane %v2611_v57, %v1043_v56  ;;  %v1049_v63 = vsub.s32 5, %v2575_v21 }
 0x753   :  { %2322 = vrot.lane.b32.xlu1 %v2321_v0, %s2474_s11 }
 0x7bb   :  { %v2313_v1 = vpop.permute.xlu1 %2312 }
 0x7bc   :  { %v2315_v3 = vunpack.i.h.bf16 %v2313_v1  ;;  %v2314_v4 = vunpack.i.l.bf16 %v2313_v1 }
 0x7be   :  { %v941_v11 = vsel %vm3195_vm10, %v891_v41, %v2315_v3  ;;  %v940_v27 = vsel %vm3196_vm0, %v888_v39, %v2314_v4  ;;  %v1050_v3 = vrot.slane %v2611_v57, %v1049_v63  ;;  %vm3208_vm10 = vcmask 1043456  }
 0x7bf   :  { %vm3209_vm0 = vmmov %vm3208_vm10 }
 0x7c0   :  { %v2318_v2 = vpop.permute.xlu0 %2317 }
 0x7c1   :  { %v2320_v7 = vunpack.i.h.bf16 %v2318_v2  ;;  %v2319_v9 = vunpack.i.l.bf16 %v2318_v2 }
 0x7c3   :  { %v944_v13 = vsel %vm942_vm7, %v941_v11, %v2320_v7  ;;  %v943_v32 = vsel %vm942_vm7, %v940_v27, %v2319_v9  ;;  %v2370_v11 = vld [vmem:[%s3138_s6] sm:$0xff]   ;;  %v2371_v27 = vld [vmem:[%s3138_s6 + $0x8] sm:$0xff]  }
 0x7c4   :  { %2196 = vmatpush3.bf16.msra.mxu0 %v2370_v11 }
 0x7c5   :  { %v2323_v10 = vpop.permute.xlu1 %2322  ;;  %2197 = vmatprep.subr.bf16.mxu0 %v2464_v49 }
 0x7c6   :  { %v2325_v23 = vunpack.i.h.bf16 %v2323_v10  ;;  %v2324_v12 = vunpack.i.l.bf16 %v2323_v10 }
 0x7c8   :  { %v947_v14 = vsel %vm945_vm15, %v944_v13, %v2325_v23  ;;  %v946_v16 = vsel %vm945_vm15, %v943_v32, %v2324_v12  ;;  %2198 = vmatpush3.bf16.msra.mxu0 %v2371_v27  ;;  %v2372_v23 = vld [vmem:[%s3138_s6 + $0x10] sm:$0xff]   ;;  %v2373_v12 = vld [vmem:[%s3138_s6 + $0x18] sm:$0xff]   ;;  %v2374_v13 = vld [vmem:[%s3138_s6 + $0x20] sm:$0xff]  }
 0x7c9   :  { %v948_v17 = vpack.c.bf16 %v947_v14, %v946_v16  ;;  %2199 = vmatprep.subr.bf16.mxu0 %v2464_v49  ;;  %v2375_v32 = vld [vmem:[%s3138_s6 + $0x28] sm:$0xff]   ;;  %v2376_v14 = vld [vmem:[%s3138_s6 + $0x30] sm:$0xff]   ;;  %v2377_v16 = vld [vmem:[%s3138_s6 + $0x38] sm:$0xff]  }
 0x7cb   :  { %2184 = vmatmul.mubr.msk.bf16.vlgmr.msra.gmra.mrb[16].mxu1 %vm3197_vm2, %v948_v17  ;;  %v1060_v17 = vsub.s32 6, %v2575_v21  ;;  %vm3210_vm2 = vmmov %vm3209_vm0 }
 0x7cc   :  { %2191 = vmatprep.mubr.msk.bf16.mxu1 %vm3190_vm6, %v2464_v49  ;;  %2188 = vmatpush3.bf16.msra.mxu1 %v2368_v46 }
 0x7cd   :  { %2189 = vmatprep.subr.bf16.mxu1 %v2464_v49  ;;  %2200 = vmatpush3.bf16.msra.mxu0 %v2372_v23 }
 0x7ce   :  { %2201 = vmatprep.subr.bf16.mxu0 %v2464_v49 }
 0x7d0   :  { %2190 = vmatpush3.bf16.msra.mxu1 %v2369_v47 }
 0x7d1   :  { %2215 = vmatprep.subr.bf16.mxu1 %v2464_v49  ;;  %2202 = vmatpush3.bf16.msra.mxu0 %v2373_v12 }
 0x7d2   :  { %2203 = vmatprep.subr.bf16.mxu0 %v2464_v49 }
 0x7d5   :  { %2204 = vmatpush3.bf16.msra.mxu0 %v2374_v13 }
 0x7d6   :  { %2205 = vmatprep.subr.bf16.mxu0 %v2464_v49 }
 0x7d9   :  { %2206 = vmatpush3.bf16.msra.mxu0 %v2375_v32 }
 0x7da   :  { %2207 = vmatprep.subr.bf16.mxu0 %v2464_v49 }
 0x7dd   :  { %2208 = vmatpush3.bf16.msra.mxu0 %v2376_v14 }
 0x7de   :  { %2209 = vmatprep.subr.bf16.mxu0 %v2464_v49 }
 0x7e1   :  { %2210 = vmatpush3.bf16.msra.mxu0 %v2377_v16  ;;  %v2378_v16 = vld [vmem:[%s3134_s3 + $0x10] sm:$0xff]  }
 0x7e2   :  { %2241 = vmatprep.subr.bf16.mxu0 %v2464_v49 }
 0x89e   :  { %v1006_v25 = vpop.f32.mrb[16].mxu1 }
 0x89f   :  { %v1007_v26 = vadd.f32 %v1006_v25, %v956_v24  ;;  %v2185_v28 = vpop.f32.mrb[17].mxu1 }
 0x8a0   :  { %v1009_v29 = vpop.f32.mrb[18].mxu1 }
 0x8a1   :  { %v2845_v30 = vadd.f32 %v1007_v26, %v2582_v34  ;;  %v1010_v31 = vadd.f32 %v1009_v29, %v956_v24  ;;  %v2186_v33 = vpop.f32.mrb[19].mxu1  ;;  %v1061_v24 = vrot.slane %v2611_v57, %v1060_v17 }
 0x8a3   :  { %v2848_v35 = vadd.f32 %v1010_v31, %v2586_v36  ;;  %v1015_v37 = vsel %vm3198_vm11, %v2845_v30, 0.0  ;;  %vm3211_vm11 = vcmask 64512  }
 0x8a4   :  { %1016 = vadd.xlane.f32.xlu0 %v1015_v37 }
 0x8a5   :  { %v1018_v38 = vsel %vm3199_vm1, %v2848_v35, 0.0  ;;  %vm3212_vm1 = vmmov %vm3211_vm11 }
 0x8a6   :  { %1019 = vadd.xlane.f32.xlu1 %v1018_v38 }
 0x931   :  { %v1017_v39 = vpop.xlane.xlu0 %1016 }
 0x932   :  { %v1021_v40 = vmul.f32 0.03125, %v1017_v39 }
 0x933   :  { %v1020_v41 = vpop.xlane.xlu1 %1019 }
 0x934   :  { %v1023_v42 = vsub.f32 %v2845_v30, %v1021_v40  ;;  %v1022_v34 = vmul.f32 0.03125, %v1020_v41 }
 0x936   :  { %v1024_v43 = vsub.f32 %v2848_v35, %v1022_v34  ;;  %v1025_v20 = vmul.f32 %v1023_v42, %v1023_v42 }
 0x938   :  { %v1027_v36 = vsel %vm3200_vm14, %v1025_v20, 0.0  ;;  %v1026_v44 = vmul.f32 %v1024_v43, %v1024_v43  ;;  %vm3213_vm14 = vmmov %vm3212_vm1 }
 0x939   :  { %1028 = vadd.xlane.f32.xlu0 %v1027_v36 }
 0x93a   :  { %v1030_v45 = vsel %vm3201_vm13, %v1026_v44, 0.0  ;;  %vm3214_vm13 = vmmov %vm3212_vm1 }
 0x93d   :  { %1031 = vadd.xlane.f32.xlu0 %v1030_v45 }
 0x9c6   :  { %v1029_v48 = vpop.xlane.xlu0 %1028 }
 0x9c7   :  { %v1033_v50 = vmul.f32 0.03125, %v1029_v48 }
 0x9c9   :  { %v1035_v51 = vadd.f32 1e-06, %v1033_v50 }
 0x9ca   :  { %v1032_v53 = vpop.xlane.xlu0 %1031 }
 0x9cb   :  { %2420 = vrsqrt.f32 %v1035_v51  ;;  %v1034_v54 = vmul.f32 0.03125, %v1032_v53 }
 0x9cd   :  { %v1036_v55 = vadd.f32 1e-06, %v1034_v54 }
 0x9cf   :  { %2422 = vrsqrt.f32 %v1036_v55  ;;  %v1155_v55 = vsub.s32 7, %v2575_v21 }
 0x9d5   :  { %v2421_v59 = vpop.eup %2420 }
 0x9d6   :  { %v1039_v62 = vmul.f32 %v2421_v59, %v1023_v42  ;;  %v1156_v59 = vrot.slane %v2611_v57, %v1155_v55 }
 0x9d8   :  { %v1045_v1 = vmul.f32 %v1044_v60, %v1039_v62 }
 0x9d9   :  { %v2423_v0 = vpop.eup %2422 }
 0x9da   :  { %v1040_v2 = vmul.f32 %v2423_v0, %v1024_v43  ;;  %v1051_v7 = vadd.f32 %v1050_v3, %v1045_v1 }
 0x9dc   :  { %v1046_v4 = vmul.f32 %v1044_v60, %v1040_v2 }
 0x9de   :  { %v1052_v9 = vadd.f32 %v1050_v3, %v1046_v4 }
 0x9e0   :  { %v1053_v10 = vpack.c.bf16 %v1052_v9, %v1051_v7 }
 0x9e2   :  { %2192 = vmatmul.mubr.msk.bf16.vlgmr.msra.gmra.mrb[20].mxu1 %vm3202_vm5, %v1053_v10  ;;  %vm3215_vm5 = vmmov %vm3212_vm1 }
 0x9e3   :  { %2219 = vmatprep.mubr.msk.bf16.mxu1 %vm3190_vm6, %v2464_v49  ;;  %2216 = vmatpush3.bf16.msra.mxu1 %v2378_v16 }
 0x9e4   :  { %2217 = vmatprep.subr.bf16.mxu1 %v2464_v49 }
 0xab5   :  { %v1111_v25 = vpop.f32.mrb[20].mxu1 }
 0xab6   :  { %v1112_v26 = vadd.f32 %v1111_v25, %v1061_v24  ;;  %v2193_v28 = vpop.f32.mrb[21].mxu1 }
 0xab7   :  { %v1114_v29 = vpop.f32.mrb[22].mxu1 }
 0xab8   :  { %v1118_v31 = vmul.f32 %v1112_v26, %v1112_v26  ;;  %v1115_v33 = vadd.f32 %v1114_v29, %v1061_v24  ;;  %v2194_v37 = vpop.f32.mrb[23].mxu1  ;;  %v2379_v24 = vld [vmem:[%s3134_s3 + $0x18] sm:$0xff]  }
 0xab9   :  { %2218 = vmatpush3.bf16.msra.mxu1 %v2379_v24  ;;  %v2944_v37 = vld [vmem:[%s3135_s7 + $0x8] sm:$0xff] }
 0xaba   :  { %v1120_v38 = vmul.f32 %v1118_v31, %v1112_v26  ;;  %v1119_v39 = vmul.f32 %v1115_v33, %v1115_v33  ;;  %2223 = vmatprep.subr.bf16.mxu1 %v2464_v49 }
 0xabc   :  { %v1122_v40 = vmul.f32 0.044715, %v1120_v38  ;;  %v1121_v41 = vmul.f32 %v1119_v39, %v1115_v33  ;;  %v1279_v38 = vrot.slane %v2944_v37, %v2578_v22  ;;  %v1297_v22 = vrot.slane %v2944_v37, %v588_v6 }
 0xabe   :  { %v1124_v42 = vadd.f32 %v1122_v40, %v1112_v26  ;;  %v1123_v34 = vmul.f32 0.044715, %v1121_v41 }
 0xac0   :  { %v1126_v43 = vmul.f32 0.7978846, %v1124_v42  ;;  %v1125_v20 = vadd.f32 %v1123_v34, %v1115_v33  ;;  %v1285_v42 = vrot.slane %v2944_v37, %v577_v61 }
 0xac2   :  { %2424 = vtanh.f32 %v1126_v43  ;;  %v1127_v36 = vmul.f32 0.7978846, %v1125_v20 }
 0xac4   :  { %2426 = vtanh.f32 %v1127_v36 }
 0xacc   :  { %v2425_v44 = vpop.eup %2424 }
 0xacd   :  { %v1130_v45 = vadd.f32 1.0, %v2425_v44 }
 0xace   :  { %v2427_v46 = vpop.eup %2426 }
 0xacf   :  { %v1132_v47 = vmul.f32 0.5, %v1130_v45  ;;  %v1131_v48 = vadd.f32 1.0, %v2427_v46 }
 0xad1   :  { %v1133_v50 = vmul.f32 0.5, %v1131_v48  ;;  %v1134_v51 = vmul.f32 %v1132_v47, %v1112_v26 }
 0xad3   :  { %v1135_v53 = vmul.f32 %v1133_v50, %v1115_v33 }
 0xad5   :  { %v1136_v54 = vpack.c.bf16 %v1135_v53, %v1134_v51 }
 0xad7   :  { %2212 = vmatmul.mubr.bf16.vlgmr.msra.gmra.mrb[16].mxu0 %v1136_v54 }
 0xad8   :  { %2247 = vmatprep.mubr.msk.bf16.mxu0 %vm3190_vm6, %v2464_v49 }
 0xbaa   :  { %v1239_v60 = vpop.f32.mrb[16].mxu0 }
 0xbab   :  { %v1240_v62 = vadd.f32 %v1239_v60, %v1156_v59  ;;  %v2213_v0 = vpop.f32.mrb[17].mxu0 }
 0xbac   :  { %v1242_v1 = vpop.f32.mrb[18].mxu0 }
 0xbad   :  { %v2920_v2 = vadd.f32 %v1240_v62, %v2845_v30  ;;  %v1243_v3 = vadd.f32 %v1242_v1, %v1156_v59  ;;  %v2214_v4 = vpop.f32.mrb[19].mxu0 }
 0xbaf   :  { %v2923_v7 = vadd.f32 %v1243_v3, %v2848_v35  ;;  %v1250_v9 = vsel %vm3203_vm4, %v2920_v2, 0.0  ;;  %vm3216_vm4 = vmmov %vm3212_vm1 }
 0xbb0   :  { %1251 = vadd.xlane.f32.xlu0 %v1250_v9 }
 0xbb1   :  { %v1253_v10 = vsel %vm3204_vm3, %v2923_v7, 0.0  ;;  %vm3217_vm3 = vcmask 392192  }
 0xbb2   :  { %1254 = vadd.xlane.f32.xlu1 %v1253_v10 }
 0xc3d   :  { %v1252_v57 = vpop.xlane.xlu0 %1251 }
 0xc3e   :  { %v1256_v11 = vmul.f32 0.03125, %v1252_v57 }
 0xc3f   :  { %v1255_v27 = vpop.xlane.xlu1 %1254 }
 0xc40   :  { %v1258_v23 = vsub.f32 %v2920_v2, %v1256_v11  ;;  %v1257_v30 = vmul.f32 0.03125, %v1255_v27 }
 0xc42   :  { %v1259_v12 = vsub.f32 %v2923_v7, %v1257_v30  ;;  %v1260_v13 = vmul.f32 %v1258_v23, %v1258_v23 }
 0xc44   :  { %v1262_v35 = vsel %vm3205_vm8, %v1260_v13, 0.0  ;;  %v1261_v32 = vmul.f32 %v1259_v12, %v1259_v12  ;;  %vm3218_vm8 = vmmov %vm3217_vm3 }
 0xc45   :  { %1263 = vadd.xlane.f32.xlu0 %v1262_v35 }
 0xc46   :  { %v1265_v14 = vsel %vm3206_vm12, %v1261_v32, 0.0  ;;  %vm3219_vm12 = vmmov %vm3217_vm3 }
 0xc47   :  { %1266 = vadd.xlane.f32.xlu1 %v1265_v14 }
 0xcd2   :  { %v1264_v25 = vpop.xlane.xlu0 %1263 }
 0xcd3   :  { %v1268_v26 = vmul.f32 0.03125, %v1264_v25 }
 0xcd4   :  { %v1267_v28 = vpop.xlane.xlu1 %1266 }
 0xcd5   :  { %v1270_v29 = vadd.f32 1e-06, %v1268_v26  ;;  %v1269_v31 = vmul.f32 0.03125, %v1267_v28 }
 0xcd7   :  { %2428 = vrsqrt.f32 %v1270_v29  ;;  %v1271_v33 = vadd.f32 1e-06, %v1269_v31 }
 0xcd9   :  { %2430 = vrsqrt.f32 %v1271_v33 }
 0xce1   :  { %v2429_v39 = vpop.eup %2428 }
 0xce2   :  { %v1274_v40 = vmul.f32 %v2429_v39, %v1258_v23 }
 0xce3   :  { %v2431_v41 = vpop.eup %2430 }
 0xce4   :  { %v1280_v34 = vmul.f32 %v1279_v38, %v1274_v40  ;;  %v1275_v43 = vmul.f32 %v2431_v41, %v1259_v12 }
 0xce6   :  { %v1281_v20 = vmul.f32 %v1279_v38, %v1275_v43  ;;  %v1286_v36 = vadd.f32 %v1285_v42, %v1280_v34 }
 0xce8   :  { %v1287_v44 = vadd.f32 %v1285_v42, %v1281_v20 }
 0xcea   :  { %v1288_v45 = vpack.c.bf16 %v1287_v44, %v1286_v36 }
 0xcec   :  { %2220 = vmatmul.mubr.msk.bf16.vlgmr.msra.gmra.mrb[24].mxu1 %vm3207_vm9, %v1288_v45  ;;  %vm3220_vm9 = vmmov %vm3217_vm3 }
 0xced   :  { %2229 = vmatprep.mubr.msk.bf16.mxu1 %vm3190_vm6, %v2464_v49 }
 0xdbf   :  { %v1347_v46 = vpop.f32.mrb[24].mxu1 }
 0xdc0   :  { %v1348_v47 = vadd.f32 %v1347_v46, %v1297_v22  ;;  %v2221_v48 = vpop.f32.mrb[25].mxu1 }
 0xdc1   :  { %v1350_v50 = vpop.f32.mrb[26].mxu1 }
 0xdc2   :  { %v1351_v61 = vadd.f32 %v1350_v50, %v1297_v22  ;;  %v2222_v51 = vpop.f32.mrb[27].mxu1  ;;  %v1356_v53 = vrot.slane %v1348_v47, 4 }
 0xdc4   :  { %v1357_v54 = vrot.slane %v1351_v61, 4  ;;  %1359 = vrot.lane.b32.xlu0 %v1356_v53, %s2466_s22 }
 0xdc6   :  { %v1358_v59 = vsel %vm3208_vm10, %v1356_v53, %v1357_v54  ;;  %vm3221_vm10 = vmmov %vm3217_vm3 }
 0xdc7   :  { %v2326_v60 = vpack.i.bf16 %v1358_v59, %v1356_v53  ;;  %1361 = vrot.lane.b32.xlu1 %v1358_v59, %s2466_s22 }
 0xdc9   :  { %2327 = vrot.lane.b32.xlu0 %v2326_v60, %s2467_s23 }
 0xdcb   :  { %1365 = vrot.lane.b32.xlu1 %v1348_v47, %s2468_s24 }
 0xdcf   :  { %1367 = vrot.lane.b32.xlu1 %v1351_v61, %s2468_s24 }
 0xe36   :  { %v1360_v6 = vpop.permute.xlu0 %1359 }
 0xe37   :  { %v1377_v62 = vsel %vm3209_vm0, %v1351_v61, %v1360_v6  ;;  %vm3222_vm0 = vmmov %vm3217_vm3 }
 0xe38   :  { %v2964_v0 = vpack.c.bf16 %v1377_v62, %v1348_v47 }
 0xe39   :  { %v1362_v1 = vpop.permute.xlu1 %1361 }
 0xe3a   :  { %1385 = vrot.lane.b32.xlu1 %v2964_v0, %s2469_s25 }
 0xe3b   :  { %v2328_v3 = vpop.permute.xlu0 %2327 }
 0xe3c   :  { %v2329_v10 = vunpack.i.l.bf16 %v2328_v3  ;;  %v2330_v57 = vunpack.i.h.bf16 %v2328_v3 }
 0xe3d   :  { %v1366_v4 = vpop.permute.xlu1 %1365 }
 0xe3e   :  { %v2968_v9 = vpack.c.bf16 %v1366_v4, %v1362_v1 }
 0xe40   :  { %1387 = vrot.lane.b32.xlu0 %v2968_v9, %s2469_s25 }
 0xe41   :  { %v1368_v11 = vpop.permute.xlu1 %1367 }
 0xe42   :  { %v1378_v27 = vsel %vm3210_vm2, %v1368_v11, %v2329_v10  ;;  %vm3223_vm2 = vmmov %vm3222_vm0 }
 0xe43   :  { %v2973_v23 = vpack.c.bf16 %v2330_v57, %v1378_v27 }
 0xe45   :  { %1389 = vrot.lane.b32.xlu1 %v2973_v23, %s2469_s25 }
 0xeac   :  { %v1386_v30 = vpop.permute.xlu1 %1385 }
 0xead   :  { %v1401_v12 = vsel %vm3211_vm11, %v1386_v30, 0  ;;  %vm3224_vm11 = vmmov %vm3222_vm0 }
 0xeae   :  { %2224 = vmatpush3.bf16.xpose.msra.mxu1 %v1401_v12 }
 0xeaf   :  { %2225 = vmatprep.subr.bf16.mxu1 %v2464_v49 }
 0xeb2   :  { %v1388_v13 = vpop.permute.xlu0 %1387 }
 0xeb3   :  { %v1404_v35 = vsel %vm3212_vm1, %v1388_v13, 0  ;;  %vm3225_vm1 = vmmov %vm3222_vm0 }
 0xeb6   :  { %2226 = vmatpush3.bf16.xpose.msra.mxu1 %v1404_v35 }
 0xeb7   :  { %2227 = vmatprep.subr.bf16.mxu1 %v2464_v49  ;;  %v1390_v32 = vpop.permute.xlu1 %1389 }
 0xeb8   :  { %v1407_v14 = vsel %vm3213_vm14, %v1390_v32, 0  ;;  %vm3226_vm14 = vmmov %vm3222_vm0 }
 0xebe   :  { %2228 = vmatpush3.bf16.xpose.msra.mxu1 %v1407_v14 }
 0xebf   :  { %2275 = vmatprep.subr.bf16.mxu1 %v2464_v49 }
 0xec5   :  { %2230 = vmatmul.mubr.msk.bf16.vlgmr.msra.gmra.mrb[28].mxu1 %vm3214_vm13, %v2964_v0  ;;  %vm3227_vm13 = vmmov %vm3222_vm0 }
 0xec6   :  { %2233 = vmatprep.mubr.msk.bf16.mxu1 %vm3190_vm6, %v2464_v49 }
 0xecd   :  { %2234 = vmatmul.mubr.msk.bf16.gmra.mrb[32].mxu1 %vm3215_vm5, %v2968_v9  ;;  %vm3228_vm5 = vmmov %vm3222_vm0 }
 0xece   :  { %2237 = vmatprep.mubr.msk.bf16.mxu1 %vm3190_vm6, %v2464_v49 }
 0xed5   :  { %2238 = vmatmul.mubr.msk.bf16.gmra.mrb[36].mxu1 %vm3216_vm4, %v2973_v23  ;;  %vm3229_vm4 = vmmov %vm3222_vm0 }
 0xed6   :  { %2291 = vmatprep.mubr.msk.bf16.mxu1 %vm3190_vm6, %v2464_v49 }
 0xf98   :  { %v1443_v16 = vpop.f32.mrb[28].mxu1 }
 0xf99   :  { %v1444_v24 = vadd.f32 %v1443_v16, %v2719_v52  ;;  %v2231_v25 = vpop.f32.mrb[29].mxu1 }
 0xf9a   :  { %v1446_v26 = vpop.f32.mrb[30].mxu1 }
 0xf9b   :  { %v1447_v28 = vadd.f32 %v1446_v26, %v2735_v58  ;;  %v2232_v29 = vpop.f32.mrb[31].mxu1  ;;  %v1466_v31 = vsel %vm3217_vm3, %v1444_v24, -inf  ;;  %vm3230_vm3 = vmmov %vm3222_vm0 }
 0xf9c   :  { %1467 = vmax.xlane.f32.xlu0 %v1466_v31 }
 0xf9d   :  { %v1469_v33 = vsel %vm3218_vm8, %v1447_v28, -inf  ;;  %vm3231_vm8 = vmmov %vm3222_vm0 }
 0xf9e   :  { %1470 = vmax.xlane.f32.xlu1 %v1469_v33 }
 0xfa0   :  { %v1451_v38 = vpop.f32.mrb[32].mxu1 }
 0xfa1   :  { %v1452_v39 = vadd.f32 %v1451_v38, %v2773_v5  ;;  %v2235_v40 = vpop.f32.mrb[33].mxu1 }
 0xfa2   :  { %v1454_v41 = vpop.f32.mrb[34].mxu1 }
 0xfa3   :  { %v1455_v42 = vadd.f32 %v1454_v41, %v2778_v8  ;;  %v2236_v34 = vpop.f32.mrb[35].mxu1  ;;  %v1472_v52 = vsel %vm3219_vm12, %v1452_v39, -inf  ;;  %vm3232_vm12 = vcmask 1043456  }
 0xfa4   :  { %1473 = vmax.xlane.f32.xlu0 %v1472_v52 }
 0xfa5   :  { %v1475_v58 = vsel %vm3220_vm9, %v1455_v42, -inf  ;;  %vm3233_vm9 = vmmov %vm3232_vm12 }
 0xfa8   :  { %1476 = vmax.xlane.f32.xlu0 %v1475_v58  ;;  %v1459_v43 = vpop.f32.mrb[36].mxu1 }
 0xfa9   :  { %v1460_v20 = vadd.f32 %v1459_v43, %v2785_v15  ;;  %v2239_v36 = vpop.f32.mrb[37].mxu1 }
 0xfaa   :  { %v1462_v44 = vpop.f32.mrb[38].mxu1 }
 0xfab   :  { %v1463_v45 = vadd.f32 %v1462_v44, %v2788_v18  ;;  %v2240_v22 = vpop.f32.mrb[39].mxu1  ;;  %v1478_v5 = vsel %vm3221_vm10, %v1460_v20, -inf  ;;  %vm3234_vm10 = vcmask 64512  }
 0xfac   :  { %1479 = vmax.xlane.f32.xlu0 %v1478_v5 }
 0xfad   :  { %v1481_v8 = vsel %vm3222_vm0, %v1463_v45, -inf  ;;  %vm3235_vm0 = vmmov %vm3234_vm10 }
 0xfae   :  { %1482 = vmax.xlane.f32.xlu1 %v1481_v8 }
0x1029   :  { %v1468_v46 = vpop.xlane.xlu0 %1467 }
0x102a   :  { %v1484_v47 = vsub.f32 %v1444_v24, %v1468_v46  ;;  %v2380_v46 = vld [vmem:[%s3136_s4 + $0x10] sm:$0xff]  }
0x102b   :  { %v1471_v48 = vpop.xlane.xlu1 %1470 }
0x102c   :  { %v1490_v50 = vmul.f32 1.442695, %v1484_v47  ;;  %v1485_v61 = vsub.f32 %v1447_v28, %v1471_v48 }
0x102e   :  { %2432 = vpow2.f32 %v1490_v50  ;;  %v1492_v51 = vmul.f32 1.442695, %v1485_v61 }
0x1030   :  { %2434 = vpow2.f32 %v1492_v51  ;;  %v2381_v51 = vld [vmem:[%s3136_s4 + $0x18] sm:$0xff]  }
0x1031   :  { %v1474_v15 = vpop.xlane.xlu0 %1473 }
0x1032   :  { %v1486_v53 = vsub.f32 %v1452_v39, %v1474_v15 }
0x1034   :  { %v1494_v54 = vmul.f32 1.442695, %v1486_v53 }
0x1035   :  { %v1477_v59 = vpop.xlane.xlu0 %1476 }
0x1036   :  { %2436 = vpow2.f32 %v1494_v54  ;;  %v1487_v18 = vsub.f32 %v1455_v42, %v1477_v59 }
0x1038   :  { %v2433_v60 = vpop.eup %2432  ;;  %v1496_v6 = vmul.f32 1.442695, %v1487_v18 }
0x1039   :  { %v1480_v62 = vpop.xlane.xlu0 %1479  ;;  %v1502_v1 = vsel %vm3223_vm2, %v2433_v60, 0.0  ;;  %vm3236_vm2 = vcmask 261120  }
0x103a   :  { %v2435_v3 = vpop.eup %2434  ;;  %2438 = vpow2.f32 %v1496_v6  ;;  %v1488_v4 = vsub.f32 %v1460_v20, %v1480_v62  ;;  %1503 = vadd.xlane.f32.xlu0 %v1502_v1 }
0x103b   :  { %v1505_v10 = vsel %vm3224_vm11, %v2435_v3, 0.0  ;;  %v1483_v32 = vpop.xlane.xlu1 %1482 }
0x103c   :  { %v1498_v57 = vmul.f32 1.442695, %v1488_v4  ;;  %1506 = vadd.xlane.f32.xlu1 %v1505_v10  ;;  %v1489_v14 = vsub.f32 %v1463_v45, %v1483_v32 }
0x103e   :  { %2440 = vpow2.f32 %v1498_v57  ;;  %v1500_v16 = vmul.f32 1.442695, %v1489_v14 }
0x1040   :  { %v2437_v11 = vpop.eup %2436  ;;  %2442 = vpow2.f32 %v1500_v16 }
0x1041   :  { %v1508_v27 = vsel %vm3225_vm1, %v2437_v11, 0.0  ;;  %vm3241_vm1 = vmmov %vm3236_vm2 }
0x1042   :  { %1509 = vadd.xlane.f32.xlu0 %v1508_v27 }
0x1044   :  { %v2439_v30 = vpop.eup %2438 }
0x1045   :  { %v1511_v12 = vsel %vm3226_vm14, %v2439_v30, 0.0  ;;  %vm3242_vm14 = vmmov %vm3241_vm1 }
0x1046   :  { %1512 = vadd.xlane.f32.xlu1 %v1511_v12 }
0x1048   :  { %v2441_v13 = vpop.eup %2440 }
0x1049   :  { %v1514_v35 = vsel %vm3227_vm13, %v2441_v13, 0.0 }
0x104a   :  { %1515 = vadd.xlane.f32.xlu0 %v1514_v35  ;;  %v2443_v24 = vpop.eup %2442 }
0x104b   :  { %v1517_v25 = vsel %vm3228_vm5, %v2443_v24, 0.0 }
0x1057   :  { %1543 = vrot.lane.b32.xlu1 %v2968_v9, %s2471_s26 }
0x1060   :  { %1541 = vrot.lane.b32.xlu0 %v2964_v0, %s2471_s26 }
0x107b   :  { %1518 = vadd.xlane.f32.xlu1 %v1517_v25 }
0x108c   :  { %1545 = vrot.lane.b32.xlu1 %v2973_v23, %s2471_s26 }
0x10c7   :  { %v1504_v26 = vpop.xlane.xlu0 %1503 }
0x10c9   :  { %v1507_v29 = vpop.xlane.xlu1 %1506 }
0x10ca   :  { %2444 = vrcp.f32 %v1507_v29 }
0x10cb   :  { %2446 = vrcp.f32 %v1504_v26 }
0x10cf   :  { %v1510_v28 = vpop.xlane.xlu0 %1509 }
0x10d3   :  { %v1513_v33 = vpop.xlane.xlu1 %1512 }
0x10d4   :  { %2448 = vrcp.f32 %v1513_v33  ;;  %v2445_v38 = vpop.eup %2444 }
0x10d5   :  { %2450 = vrcp.f32 %v1510_v28  ;;  %v2447_v23 = vpop.eup %2446  ;;  %v1533_v40 = vmul.f32 %v2445_v38, %v2435_v3 }
0x10d6   :  { %v1532_v41 = vmul.f32 %v2447_v23, %v2433_v60  ;;  %v1660_v23 = vrot.slane %v2944_v37, %v955_v19 }
0x10d7   :  { %v1516_v31 = vpop.xlane.xlu0 %1515  ;;  %v1544_v0 = vpop.permute.xlu1 %1543 }
0x10d8   :  { %v1538_v34 = vpack.c.bf16 %v1533_v40, %v1532_v41 }
0x10db   :  { %v1542_v9 = vpop.permute.xlu0 %1541 }
0x10dc   :  { %2242 = vmatpush3.bf16.msra.mxu0 %v1542_v9 }
0x10dd   :  { %2243 = vmatprep.subr.bf16.mxu0 %v2464_v49 }
0x10de   :  { %v2449_v52 = vpop.eup %2448 }
0x10df   :  { %v2451_v58 = vpop.eup %2450  ;;  %v1535_v43 = vmul.f32 %v2449_v52, %v2439_v30 }
0x10e0   :  { %2244 = vmatpush3.bf16.msra.mxu0 %v1544_v0  ;;  %v1534_v20 = vmul.f32 %v2451_v58, %v2437_v11 }
0x10e1   :  { %2245 = vmatprep.subr.bf16.mxu0 %v2464_v49 }
0x10e2   :  { %v1539_v36 = vpack.c.bf16 %v1535_v43, %v1534_v20 }
0x1108   :  { %v1519_v39 = vpop.xlane.xlu1 %1518 }
0x1109   :  { %2452 = vrcp.f32 %v1519_v39 }
0x110a   :  { %2454 = vrcp.f32 %v1516_v31 }
0x110c   :  { %v1546_v42 = vpop.permute.xlu1 %1545 }
0x110d   :  { %2246 = vmatpush3.bf16.msra.mxu0 %v1546_v42 }
0x110e   :  { %2259 = vmatprep.subr.bf16.mxu0 %v2464_v49 }
0x1110   :  { %2248 = vmatmul.mubr.msk.bf16.vlgmr.msra.gmra.mrb[20].mxu0 %vm3229_vm4, %v1538_v34 }
0x1111   :  { %2251 = vmatprep.mubr.msk.bf16.mxu0 %vm3190_vm6, %v2464_v49  ;;  %2260 = vmatpush3.bf16.msra.mxu0 %v2380_v46 }
0x1112   :  { %2261 = vmatprep.subr.bf16.mxu0 %v2464_v49 }
0x1113   :  { %v2453_v44 = vpop.eup %2452 }
0x1114   :  { %v2455_v45 = vpop.eup %2454  ;;  %v1537_v22 = vmul.f32 %v2453_v44, %v2443_v24 }
0x1115   :  { %v1536_v5 = vmul.f32 %v2455_v45, %v2441_v13  ;;  %2262 = vmatpush3.bf16.msra.mxu0 %v2381_v51 }
0x1116   :  { %2267 = vmatprep.subr.bf16.mxu0 %v2464_v49 }
0x1117   :  { %v1540_v8 = vpack.c.bf16 %v1537_v22, %v1536_v5 }
0x1118   :  { %2252 = vmatmul.mubr.msk.bf16.gmra.mrb[24].mxu0 %vm3230_vm3, %v1539_v36 }
0x1119   :  { %2255 = vmatprep.mubr.msk.bf16.mxu0 %vm3190_vm6, %v2464_v49 }
0x1120   :  { %2256 = vmatmul.mubr.msk.bf16.gmra.mrb[28].mxu0 %vm3231_vm8, %v1540_v8 }
0x1121   :  { %2263 = vmatprep.mubr.msk.bf16.mxu0 %vm3190_vm6, %v2464_v49 }
0x11e3   :  { %v1593_v47 = vpop.f32.mrb[20].mxu0 }
0x11e4   :  { %v2249_v48 = vpop.f32.mrb[21].mxu0 }
0x11e5   :  { %v1596_v50 = vpop.f32.mrb[22].mxu0 }
0x11e6   :  { %v2250_v61 = vpop.f32.mrb[23].mxu0  ;;  %v1618_v53 = vrot.slane %v1596_v50, 4 }
0x11e7   :  { %v2383_v61 = vld [vmem:[%s3137_s5 + $0x18] sm:$0xff]  }
0x11eb   :  { %v1601_v15 = vpop.f32.mrb[24].mxu0 }
0x11ec   :  { %v1619_v54 = vrot.slane %v1601_v15, 4  ;;  %v2253_v59 = vpop.f32.mrb[25].mxu0 }
0x11ed   :  { %v1604_v18 = vpop.f32.mrb[26].mxu0 }
0x11ee   :  { %v1620_v60 = vsel %vm3232_vm12, %v1618_v53, %v1619_v54  ;;  %v2254_v6 = vpop.f32.mrb[27].mxu0 }
0x11ef   :  { %v2331_v62 = vpack.i.bf16 %v1619_v54, %v1620_v60  ;;  %v1748_v6 = vrot.slane %v2944_v37, %v1043_v56  ;;  %v2385_v56 = vld [vmem:[%s3138_s6 + $0x48] sm:$0xff]  }
0x11f1   :  { %2332 = vrot.lane.b32.xlu1 %v2331_v62, %s2472_s9 }
0x11f3   :  { %v1609_v1 = vpop.f32.mrb[28].mxu0 }
0x11f4   :  { %v2336_v3 = vpack.i.bf16 %v1609_v1, %v1604_v18  ;;  %v2257_v4 = vpop.f32.mrb[29].mxu0  ;;  %v1636_v57 = vrot.slane %v1609_v1, 4 }
0x11f5   :  { %v1612_v10 = vpop.f32.mrb[30].mxu0 }
0x11f6   :  { %v1637_v11 = vrot.slane %v1612_v10, 4  ;;  %2337 = vrot.lane.b32.xlu0 %v2336_v3, %s2473_s10  ;;  %v2258_v27 = vpop.f32.mrb[31].mxu0  ;;  %v1754_v10 = vrot.slane %v2944_v37, %v1049_v63  ;;  %v2386_v63 = vld [vmem:[%s3138_s6 + $0x50] sm:$0xff]  }
0x11f8   :  { %v1638_v30 = vsel %vm3233_vm9, %v1636_v57, %v1637_v11 }
0x11f9   :  { %v2341_v12 = vpack.i.bf16 %v1637_v11, %v1638_v30 }
0x11fb   :  { %2342 = vrot.lane.b32.xlu1 %v2341_v12, %s2474_s11  ;;  %v2384_v12 = vld [vmem:[%s3138_s6 + $0x40] sm:$0xff]  }
0x11fc   :  { %2276 = vmatpush3.bf16.msra.mxu1 %v2384_v12 }
0x11fd   :  { %2277 = vmatprep.subr.bf16.mxu1 %v2464_v49 }
0x1200   :  { %2278 = vmatpush3.bf16.msra.mxu1 %v2385_v56 }
0x1201   :  { %2279 = vmatprep.subr.bf16.mxu1 %v2464_v49 }
0x1204   :  { %2280 = vmatpush3.bf16.msra.mxu1 %v2386_v63 }
0x1205   :  { %2281 = vmatprep.subr.bf16.mxu1 %v2464_v49 }
0x1263   :  { %v2333_v13 = vpop.permute.xlu1 %2332 }
0x1264   :  { %v2335_v32 = vunpack.i.h.bf16 %v2333_v13  ;;  %v2334_v14 = vunpack.i.l.bf16 %v2333_v13  ;;  %v2387_v13 = vld [vmem:[%s3138_s6 + $0x58] sm:$0xff]  }
0x1265   :  { %2282 = vmatpush3.bf16.msra.mxu1 %v2387_v13 }
0x1266   :  { %v1646_v26 = vsel %vm3234_vm10, %v1596_v50, %v2335_v32  ;;  %v1645_v28 = vsel %vm3235_vm0, %v1593_v47, %v2334_v14  ;;  %v2382_v50 = vld [vmem:[%s3137_s5 + $0x10] sm:$0xff]   ;;  %2283 = vmatprep.subr.bf16.mxu1 %v2464_v49  ;;  %v2389_v32 = vld [vmem:[%s3138_s6 + $0x68] sm:$0xff]  }
0x1267   :  { %v2390_v14 = vld [vmem:[%s3138_s6 + $0x70] sm:$0xff]  }
0x1268   :  { %v2338_v35 = vpop.permute.xlu0 %2337 }
0x1269   :  { %v2340_v16 = vunpack.i.h.bf16 %v2338_v35  ;;  %v2339_v24 = vunpack.i.l.bf16 %v2338_v35  ;;  %v2388_v35 = vld [vmem:[%s3138_s6 + $0x60] sm:$0xff]  }
0x126a   :  { %2284 = vmatpush3.bf16.msra.mxu1 %v2388_v35 }
0x126b   :  { %v1648_v33 = vsel %vm942_vm7, %v1646_v26, %v2340_v16  ;;  %v1647_v9 = vsel %vm942_vm7, %v1645_v28, %v2339_v24  ;;  %vm3237_vm7 = vmmov %vm3236_vm2  ;;  %2285 = vmatprep.subr.bf16.mxu1 %v2464_v49  ;;  %v2391_v16 = vld [vmem:[%s3138_s6 + $0x78] sm:$0xff]   ;;  %v1766_v24 = vrot.slane %v2944_v37, %v1060_v17 }
0x126d   :  { %v2343_v25 = vpop.permute.xlu1 %2342 }
0x126e   :  { %v2345_v29 = vunpack.i.h.bf16 %v2343_v25  ;;  %v2344_v31 = vunpack.i.l.bf16 %v2343_v25  ;;  %2286 = vmatpush3.bf16.msra.mxu1 %v2389_v32 }
0x126f   :  { %2287 = vmatprep.subr.bf16.mxu1 %v2464_v49 }
0x1270   :  { %v1650_v0 = vsel %vm945_vm15, %v1648_v33, %v2345_v29  ;;  %v1649_v38 = vsel %vm945_vm15, %v1647_v9, %v2344_v31  ;;  %vm3239_vm15 = vmmov %vm3236_vm2 }
0x1271   :  { %v1651_v39 = vpack.c.bf16 %v1650_v0, %v1649_v38 }
0x1272   :  { %2288 = vmatpush3.bf16.msra.mxu1 %v2390_v14 }
0x1273   :  { %2264 = vmatmul.mubr.msk.bf16.vlgmr.msra.gmra.mrb[32].mxu0 %vm3236_vm2, %v1651_v39  ;;  %2289 = vmatprep.subr.bf16.mxu1 %v2464_v49 }
0x1274   :  { %2271 = vmatprep.mubr.msk.bf16.mxu0 %vm3190_vm6, %v2464_v49  ;;  %vm3238_vm6 = vcmask 257024   ;;  %2268 = vmatpush3.bf16.msra.mxu0 %v2382_v50 }
0x1275   :  { %vm3240_vm11 = vmmov %vm3238_vm6  ;;  %2269 = vmatprep.subr.bf16.mxu0 %v2464_v49 }
0x1276   :  { %2290 = vmatpush3.bf16.msra.mxu1 %v2391_v16  ;;  %vm3243_vm13 = vmmov %vm3238_vm6 }
0x1278   :  { %2270 = vmatpush3.bf16.msra.mxu0 %v2383_v61 }
0x1346   :  { %v1710_v40 = vpop.f32.mrb[32].mxu0 }
0x1347   :  { %v1711_v41 = vadd.f32 %v1710_v40, %v1660_v23  ;;  %v2265_v42 = vpop.f32.mrb[33].mxu0 }
0x1348   :  { %v1713_v34 = vpop.f32.mrb[34].mxu0 }
0x1349   :  { %v3057_v52 = vadd.f32 %v1711_v41, %v2920_v2  ;;  %v1714_v58 = vadd.f32 %v1713_v34, %v1660_v23  ;;  %v2266_v43 = vpop.f32.mrb[35].mxu0 }
0x134b   :  { %v3060_v20 = vadd.f32 %v1714_v58, %v2923_v7  ;;  %v1719_v36 = vsel %vm3237_vm7, %v3057_v52, 0.0 }
0x134c   :  { %1720 = vadd.xlane.f32.xlu0 %v1719_v36 }
0x134d   :  { %v1722_v44 = vsel %vm3238_vm6, %v3060_v20, 0.0 }
0x134e   :  { %1723 = vadd.xlane.f32.xlu1 %v1722_v44 }
0x13d9   :  { %v1721_v19 = vpop.xlane.xlu0 %1720 }
0x13da   :  { %v1725_v45 = vmul.f32 0.03125, %v1721_v19 }
0x13db   :  { %v1724_v22 = vpop.xlane.xlu1 %1723 }
0x13dc   :  { %v1727_v5 = vsub.f32 %v3057_v52, %v1725_v45  ;;  %v1726_v2 = vmul.f32 0.03125, %v1724_v22 }
0x13de   :  { %v1728_v8 = vsub.f32 %v3060_v20, %v1726_v2  ;;  %v1729_v46 = vmul.f32 %v1727_v5, %v1727_v5  ;;  %v1862_v2 = vrot.slane %v2944_v37, %v1155_v55 }
0x13e0   :  { %v1731_v7 = vsel %vm3239_vm15, %v1729_v46, 0.0  ;;  %v1730_v47 = vmul.f32 %v1728_v8, %v1728_v8 }
0x13e1   :  { %1732 = vadd.xlane.f32.xlu0 %v1731_v7 }
0x13e2   :  { %v1734_v48 = vsel %vm3240_vm11, %v1730_v47, 0.0 }
0x13e5   :  { %1735 = vadd.xlane.f32.xlu0 %v1734_v48 }
0x146e   :  { %v1733_v51 = vpop.xlane.xlu0 %1732 }
0x146f   :  { %v1737_v15 = vmul.f32 0.03125, %v1733_v51 }
0x1471   :  { %v1739_v53 = vadd.f32 1e-06, %v1737_v15 }
0x1472   :  { %v1736_v54 = vpop.xlane.xlu0 %1735 }
0x1473   :  { %2456 = vrsqrt.f32 %v1739_v53  ;;  %v1738_v59 = vmul.f32 0.03125, %v1736_v54 }
0x1475   :  { %v1740_v18 = vadd.f32 1e-06, %v1738_v59 }
0x1477   :  { %2458 = vrsqrt.f32 %v1740_v18 }
0x147d   :  { %v2457_v60 = vpop.eup %2456 }
0x147e   :  { %v1743_v62 = vmul.f32 %v2457_v60, %v1727_v5 }
0x1480   :  { %v1749_v3 = vmul.f32 %v1748_v6, %v1743_v62 }
0x1481   :  { %v2459_v1 = vpop.eup %2458 }
0x1482   :  { %v1744_v4 = vmul.f32 %v2459_v1, %v1728_v8  ;;  %v1755_v11 = vadd.f32 %v1754_v10, %v1749_v3 }
0x1484   :  { %v1750_v57 = vmul.f32 %v1748_v6, %v1744_v4 }
0x1486   :  { %v1756_v27 = vadd.f32 %v1754_v10, %v1750_v57 }
0x1488   :  { %v1757_v30 = vpack.c.bf16 %v1756_v27, %v1755_v11 }
0x148a   :  { %2272 = vmatmul.mubr.msk.bf16.vlgmr.msra.gmra.mrb[36].mxu0 %vm3241_vm1, %v1757_v30 }
0x155d   :  { %v1816_v25 = vpop.f32.mrb[36].mxu0 }
0x155e   :  { %v1817_v26 = vadd.f32 %v1816_v25, %v1766_v24  ;;  %v2273_v28 = vpop.f32.mrb[37].mxu0 }
0x155f   :  { %v1819_v29 = vpop.f32.mrb[38].mxu0 }
0x1560   :  { %v1823_v31 = vmul.f32 %v1817_v26, %v1817_v26  ;;  %v1820_v33 = vadd.f32 %v1819_v29, %v1766_v24  ;;  %v2274_v9 = vpop.f32.mrb[39].mxu0 }
0x1562   :  { %v1825_v0 = vmul.f32 %v1823_v31, %v1817_v26  ;;  %v1824_v38 = vmul.f32 %v1820_v33, %v1820_v33 }
0x1564   :  { %v1827_v39 = vmul.f32 0.044715, %v1825_v0  ;;  %v1826_v49 = vmul.f32 %v1824_v38, %v1820_v33 }
0x1566   :  { %v1829_v23 = vadd.f32 %v1827_v39, %v1817_v26  ;;  %v1828_v40 = vmul.f32 0.044715, %v1826_v49 }
0x1568   :  { %v1831_v41 = vmul.f32 0.7978846, %v1829_v23  ;;  %v1830_v42 = vadd.f32 %v1828_v40, %v1820_v33 }
0x156a   :  { %2460 = vtanh.f32 %v1831_v41  ;;  %v1832_v34 = vmul.f32 0.7978846, %v1830_v42 }
0x156c   :  { %2462 = vtanh.f32 %v1832_v34 }
0x1574   :  { %v2461_v58 = vpop.eup %2460 }
0x1575   :  { %v1835_v17 = vadd.f32 1.0, %v2461_v58 }
0x1576   :  { %v2463_v43 = vpop.eup %2462 }
0x1577   :  { %v1837_v36 = vmul.f32 0.5, %v1835_v17  ;;  %v1836_v44 = vadd.f32 1.0, %v2463_v43 }
0x1579   :  { %v1838_v19 = vmul.f32 0.5, %v1836_v44  ;;  %v1839_v45 = vmul.f32 %v1837_v36, %v1817_v26 }
0x157b   :  { %v1840_v22 = vmul.f32 %v1838_v19, %v1820_v33 }
0x157d   :  { %v1841_v5 = vpack.c.bf16 %v1840_v22, %v1839_v45 }
0x157f   :  { %2292 = vmatmul.mubr.bf16.vlgmr.msra.gmra.mrb[40].mxu1 %v1841_v5 }
0x1652   :  { %v1945_v8 = vpop.f32.mrb[40].mxu1 }
0x1653   :  { %v1946_v46 = vadd.f32 %v1945_v8, %v1862_v2  ;;  %v2293_v7 = vpop.f32.mrb[41].mxu1 }
0x1654   :  { %v1948_v47 = vpop.f32.mrb[42].mxu1 }
0x1655   :  { %v1952_v48 = vadd.f32 %v1946_v46, %v3057_v52  ;;  %v1949_v50 = vadd.f32 %v1948_v47, %v1862_v2  ;;  %v2294_v61 = vpop.f32.mrb[43].mxu1 }
0x1657   :  { %1954 = vst.msk [vmem:[%s3139_s8] sm:$0xff] %vm3242_vm14, %v1952_v48  ;;  %v1953_v51 = vadd.f32 %v1949_v50, %v3060_v20 }
0x1659   :  { %1955 = vst.msk [vmem:[%s3139_s8 + $0x8] sm:$0xf] %vm3243_vm13, %v1953_v51 }

</bundles_post_ra>
